<compile_context>
chip_gen: v7x
topology: tpu7x:2x2x1
jax: 0.10.0
libtpu: 0.0.40
codegen_flags: <defaults>
</compile_context>

<pallas_src>
import functools

import jax
import jax.numpy as jnp
from jax.experimental import pallas as pl
from jax.experimental.pallas import tpu as pltpu

# VGG19 feature config up to (and including) layer 35 == ReLU after conv5_4.
# (The 5th MaxPool is layer 36 and is applied separately as `self.max_pool`;
#  it is fused into conv5_4's epilogue below.)
VGG19_CFG = [64, 64, 'M', 128, 128, 'M', 256, 256, 256, 256, 'M',
             512, 512, 512, 512, 'M', 512, 512, 512, 512]


def _default_vmem_limit():
    # Generation-aware VMEM budget: <= 3/4 of physical (v7x: 64 MiB -> 48 MiB,
    # v5e/v6e: 128 MiB -> 96 MiB). Safe fallback = 48 MiB (fits every generation).
    try:
        info = pltpu.get_tpu_info()
        cap = getattr(info, "vmem_capacity_bytes", None)
        if cap:
            return int(min(cap * 3 // 4, 96 * 1024 * 1024))
    except Exception:
        pass
    return 48 * 1024 * 1024


_VMEM_LIMIT = _default_vmem_limit()


def _pick_row_tile(H, W, need_even):
    """Largest divisor of H within a VMEM-aware output-pixel budget per block."""
    # v5e/v6e (96 MiB budget): ~64-72 rows at width 224. v7x (48 MiB): ~32 rows.
    budget = 16384 if _VMEM_LIMIT >= 64 * 1024 * 1024 else 7168
    cap = max(2 if need_even else 1, min(H, max(1, budget // max(W, 1))))
    for th in range(cap, 0, -1):
        if H % th != 0:
            continue
        if need_even and th % 2 != 0:
            continue
        return th
    return H


# --------------------- 3x3 conv + ReLU (+ fused 2x2 maxpool) ---------------------
def _conv3x3_relu_kernel(xm_ref, xt_ref, xb_ref, w_ref, b_ref, o_ref,
                         *, fuse_pool, fuse_kw):
    # xm_ref: (1, th, W+2, Cin) bf16 — main row block of the W-padded input
    # xt_ref: (1, 1, W+2, Cin)  bf16 — row above the block (zeroed at the top border)
    # xb_ref: (1, 1, W+2, Cin)  bf16 — row below the block (zeroed at the bottom border)
    # w_ref : (3, 3*Cin, tc) bf16 if fuse_kw else (3, 3, Cin, tc) bf16
    # b_ref : (1, tc) f32
    # o_ref : (1, th, W, tc) or (1, th//2, W//2, tc) bf16
    th = xm_ref.shape[1]
    Wp = xm_ref.shape[2]
    W = Wp - 2
    Cin = xm_ref.shape[3]
    Cout = o_ref.shape[3]

    i = pl.program_id(1)
    last = pl.num_programs(1) - 1

    main = xm_ref[0]                                           # (th, W+2, Cin)
    top = xt_ref[0] * (i > 0).astype(main.dtype)               # zero at top border
    bot = xb_ref[0] * (i < last).astype(main.dtype)            # zero at bottom border
    win = jnp.concatenate([top, main, bot], axis=0)            # (th+2, W+2, Cin)

    # Accumulate in a local f32 value (single bf16 store at the end).
    acc = None
    if fuse_kw:
        # One K=3*Cin matmul per kh (concat pieces are 128-lane aligned: Cin==128).
        for kh in range(3):
            rows = win[kh:kh + th]                             # (th, W+2, Cin)
            patch = jnp.concatenate(
                [rows[:, kw:kw + W, :] for kw in range(3)], axis=-1)   # (th, W, 3*Cin)
            t = jnp.dot(patch.reshape(th * W, 3 * Cin), w_ref[kh],
                        preferred_element_type=jnp.float32)
            acc = t if acc is None else acc + t
    else:
        for kh in range(3):
            rows = win[kh:kh + th]                             # (th, W+2, Cin)
            for kw in range(3):
                patch = rows[:, kw:kw + W, :].reshape(th * W, Cin)
                t = jnp.dot(patch, w_ref[kh, kw],
                            preferred_element_type=jnp.float32)
                acc = t if acc is None else acc + t

    r = jnp.maximum(acc + b_ref[...], 0.0)                     # f32 epilogue
    r = r.reshape(th, W, Cout)
    if fuse_pool:
        r = r.reshape(th // 2, 2, W // 2, 2, Cout).max(axis=3).max(axis=1)
    o_ref[0] = r.astype(o_ref.dtype)


def conv3x3_relu(x, w, b, fuse_pool):
    """x: (N,H,W,Cin) bf16, w: (3,3,Cin,Cout) bf16, b: (Cout,) f32."""
    N, H, W, Cin = x.shape
    Cout = w.shape[3]
    if fuse_pool:
        assert H % 2 == 0 and W % 2 == 0, "fused 2x2 maxpool needs even H and W"

    th = _pick_row_tile(H, W, need_even=fuse_pool)
    n_row_blocks = H // th
    # Cout tiling for the deep layers (spatial grid collapsed): v7x megacore + VMEM.
    tc = 256 if (Cout > 256 and n_row_blocks <= 2) else Cout
    n_c_blocks = Cout // tc

    # kw-tap fusion only where the concat pieces are 128-lane aligned (Cin == 128).
    fuse_kw = (Cin == 128)
    if fuse_kw:
        wk = w.reshape(3, 3 * Cin, Cout)                       # (kh, kw*Cin, Cout)
        wspec = pl.BlockSpec((3, 3 * Cin, tc), lambda n, i, c: (0, 0, c))
    else:
        wk = w
        wspec = pl.BlockSpec((3, 3, Cin, tc), lambda n, i, c: (0, 0, 0, c))

    # Pad W only; the H-halo comes from two 1-row BlockSpecs on the same array.
    xp = jnp.pad(x, ((0, 0), (0, 0), (1, 1), (0, 0)))          # (N, H, W+2, Cin)

    Ho, Wo = (H // 2, W // 2) if fuse_pool else (H, W)
    oth = th // 2 if fuse_pool else th

    main_spec = pl.BlockSpec((1, th, W + 2, Cin), lambda n, i, c: (n, i, 0, 0))
    top_spec = pl.BlockSpec(
        (1, 1, W + 2, Cin), lambda n, i, c: (n, jnp.maximum(i * th - 1, 0), 0, 0))
    bot_spec = pl.BlockSpec(
        (1, 1, W + 2, Cin), lambda n, i, c: (n, jnp.minimum(i * th + th, H - 1), 0, 0))

    flops = int(2 * N * H * W * 9 * Cin * Cout)
    bytes_accessed = int(N * H * (W + 2) * Cin * 2 + 9 * Cin * Cout * 2
                         + Cout * 4 + N * Ho * Wo * Cout * 2)

    kernel = functools.partial(_conv3x3_relu_kernel,
                               fuse_pool=fuse_pool, fuse_kw=fuse_kw)
    return pl.pallas_call(
        kernel,
        out_shape=jax.ShapeDtypeStruct((N, Ho, Wo, Cout), jnp.bfloat16),
        grid=(N, n_row_blocks, n_c_blocks),
        in_specs=[
            main_spec, top_spec, bot_spec, wspec,
            pl.BlockSpec((1, tc), lambda n, i, c: (0, c)),
        ],
        out_specs=pl.BlockSpec((1, oth, Wo, tc), lambda n, i, c: (n, i, 0, c)),
        compiler_params=pltpu.CompilerParams(
            dimension_semantics=("parallel", "parallel", "parallel"),
            vmem_limit_bytes=_VMEM_LIMIT),
        cost_estimate=pl.CostEstimate(flops=flops, transcendentals=0,
                                      bytes_accessed=bytes_accessed),
    )(xp, xp, xp, wk, b.reshape(1, Cout))


# --------------------- conv1_1 (Cin=3) via im2col: one K=27 matmul ---------------------
def _patch_matmul_relu_kernel(p_ref, w_ref, b_ref, o_ref):
    # p_ref: (1, th, W, K=27) bf16 im2col patches, w_ref: (K, Cout) bf16, b_ref: (1, Cout) f32
    th, W, K = p_ref.shape[1], p_ref.shape[2], p_ref.shape[3]
    Cout = w_ref.shape[1]
    p = p_ref[0].reshape(th * W, K)
    r = jnp.dot(p, w_ref[...], preferred_element_type=jnp.float32) + b_ref[...]
    r = jnp.maximum(r, 0.0)
    o_ref[0] = r.reshape(th, W, Cout).astype(o_ref.dtype)


def conv3x3_first(x, w, b):
    """First VGG conv (Cin=3): wrapper-side im2col, single matmul per row block."""
    N, H, W, Cin = x.shape
    Cout = w.shape[3]
    xp = jnp.pad(x, ((0, 0), (1, 1), (1, 1), (0, 0)))
    # patches[..., (kh*3+kw)*Cin + c] == xp[:, kh+h, kw+w, c]  (matches w.reshape order)
    patches = jnp.concatenate(
        [xp[:, kh:kh + H, kw:kw + W, :] for kh in range(3) for kw in range(3)], axis=-1)
    K = 9 * Cin
    wf = w.reshape(K, Cout)
    th = _pick_row_tile(H, W, need_even=False)

    flops = int(2 * N * H * W * K * Cout)
    bytes_accessed = int(N * H * W * K * 2 + K * Cout * 2 + Cout * 4
                         + N * H * W * Cout * 2)
    return pl.pallas_call(
        _patch_matmul_relu_kernel,
        out_shape=jax.ShapeDtypeStruct((N, H, W, Cout), jnp.bfloat16),
        grid=(N, H // th),
        in_specs=[
            pl.BlockSpec((1, th, W, K), lambda n, i: (n, i, 0, 0)),
            pl.BlockSpec((K, Cout), lambda n, i: (0, 0)),
            pl.BlockSpec((1, Cout), lambda n, i: (0, 0)),
        ],
        out_specs=pl.BlockSpec((1, th, W, Cout), lambda n, i: (n, i, 0, 0)),
        compiler_params=pltpu.CompilerParams(
            dimension_semantics=("parallel", "parallel"),
            vmem_limit_bytes=_VMEM_LIMIT),
        cost_estimate=pl.CostEstimate(flops=flops, transcendentals=0,
                                      bytes_accessed=bytes_accessed),
    )(patches, wf, b.reshape(1, Cout))


# ------------------------------ linear (+ReLU) ------------------------------
def _linear_kernel(x_ref, w_ref, b_ref, o_ref, acc_ref, *, apply_relu):
    k = pl.program_id(2)

    @pl.when(k == 0)
    def _():
        acc_ref[...] = jnp.zeros_like(acc_ref)

    acc_ref[...] += jnp.dot(x_ref[...], w_ref[...],
                            preferred_element_type=jnp.float32)

    @pl.when(k == pl.num_programs(2) - 1)
    def _():
        r = acc_ref[...] + b_ref[...]
        if apply_relu:
            r = jnp.maximum(r, 0.0)
        o_ref[...] = r.astype(o_ref.dtype)


def _pick_tile(dim, candidates):
    for c in candidates:
        if dim % c == 0:
            return c
    return dim


def linear(x, w, b, apply_relu, out_dtype):
    """x: (M,K) bf16, w: (K,N) bf16 (torch weight transposed), b: (N,) f32."""
    M, K = x.shape
    N = w.shape[1]
    # Lane-dense output: pad N to a multiple of 128 so stores are unmasked; slice after.
    Np = max(128, ((N + 127) // 128) * 128)
    if Np != N:
        w = jnp.pad(w, ((0, 0), (0, Np - N)))
        b = jnp.pad(b, (0, Np - N))

    tm = M
    tk = _pick_tile(K, (2048, 1792, 1536, 1024, 512, 384, 256, 128))
    # Full-N weight tiles (weight-streaming bound at small batch): fewer grid steps.
    tn = _pick_tile(Np, (4096, 2048, 1024, 512, 256, 128))

    flops = int(2 * M * K * Np)
    bytes_accessed = int(M * K * 2 + K * Np * 2 + Np * 4
                         + M * Np * jnp.dtype(out_dtype).itemsize)

    kernel = functools.partial(_linear_kernel, apply_relu=apply_relu)
    out = pl.pallas_call(
        kernel,
        out_shape=jax.ShapeDtypeStruct((M, Np), out_dtype),
        grid_spec=pltpu.PrefetchScalarGridSpec(
            num_scalar_prefetch=0,
            grid=(M // tm, Np // tn, K // tk),
            in_specs=[
                pl.BlockSpec((tm, tk), lambda i, j, k: (i, k)),
                pl.BlockSpec((tk, tn), lambda i, j, k: (k, j)),
                pl.BlockSpec((1, tn), lambda i, j, k: (0, j)),
            ],
            out_specs=pl.BlockSpec((tm, tn), lambda i, j, k: (i, j)),
            scratch_shapes=[pltpu.VMEM((tm, tn), jnp.float32)],
        ),
        compiler_params=pltpu.CompilerParams(
            dimension_semantics=("parallel", "parallel", "arbitrary"),
            vmem_limit_bytes=_VMEM_LIMIT),
        cost_estimate=pl.CostEstimate(flops=flops, transcendentals=0,
                                      bytes_accessed=bytes_accessed),
    )(x, w, b.reshape(1, Np))
    return out[:, :N] if Np != N else out


# ------------------------- adaptive avg pool (XLA glue) -------------------------
def adaptive_avg_pool_nhwc(x, out_hw=7):
    """Matches torch AdaptiveAvgPool2d((7,7)) bin boundaries. x: (N,H,W,C) f32."""
    N, H, W, C = x.shape
    rows = []
    for i in range(out_hw):
        h0, h1 = (i * H) // out_hw, -((-(i + 1) * H) // out_hw)
        cols = []
        for j in range(out_hw):
            w0, w1 = (j * W) // out_hw, -((-(j + 1) * W) // out_hw)
            cols.append(jnp.mean(x[:, h0:h1, w0:w1, :], axis=(1, 2)))
        rows.append(jnp.stack(cols, axis=1))
    return jnp.stack(rows, axis=1)   # (N, 7, 7, C)


# ------------------------------ parameters ---------------------------------
def _layer_plan():
    """[(cout, fuse_pool)] for the 16 convs; the final conv fuses self.max_pool."""
    plan = []
    for idx, v in enumerate(VGG19_CFG):
        if v == 'M':
            continue
        nxt = VGG19_CFG[idx + 1] if idx + 1 < len(VGG19_CFG) else 'M'
        plan.append((v, nxt == 'M'))
    return plan


def init_params(key, num_classes):
    params = {"convs": [], "fcs": []}
    keys = jax.random.split(key, 32)
    ki = 0
    cin = 3
    for v in VGG19_CFG:
        if v == 'M':
            continue
        fan_in = 9 * cin
        w = (jax.random.normal(keys[ki], (3, 3, cin, v), jnp.float32)
             * jnp.sqrt(2.0 / fan_in)).astype(jnp.bfloat16)
        b = jnp.zeros((v,), jnp.float32)
        params["convs"].append((w, b))
        cin = v
        ki += 1
    for (kdim, ndim) in [(512 * 7 * 7, 4096), (4096, 4096), (4096, num_classes)]:
        w = (jax.random.normal(keys[ki], (kdim, ndim), jnp.float32)
             * jnp.sqrt(2.0 / kdim)).astype(jnp.bfloat16)
        b = jnp.zeros((ndim,), jnp.float32)
        params["fcs"].append((w, b))
        ki += 1
    return params


# ------------------------------ forward pass --------------------------------
def vgg19_forward(params, x_nchw):
    x = jnp.transpose(x_nchw, (0, 2, 3, 1)).astype(jnp.bfloat16)   # NCHW -> NHWC
    plan = _layer_plan()
    for li, (cout, fuse_pool) in enumerate(plan):
        w, b = params["convs"][li]
        if li == 0:
            assert not fuse_pool
            x = conv3x3_first(x, w, b)                  # im2col path (Cin=3)
        else:
            x = conv3x3_relu(x, w, b, fuse_pool=fuse_pool)
    # TODO(synk): x.register_hook(...) is an autograd gradient hook; no forward effect.
    # The last plan entry already applied self.max_pool fused into conv5_4's epilogue.
    if x.shape[1] == 7 and x.shape[2] == 7:
        pooled = x                                       # AdaptiveAvgPool2d((7,7)) identity
    else:
        pooled = adaptive_avg_pool_nhwc(x.astype(jnp.float32), 7).astype(jnp.bfloat16)
    n = pooled.shape[0]
    # torch flattens the NCHW tensor: match (C, H, W) element order exactly.
    xf = jnp.transpose(pooled, (0, 3, 1, 2)).reshape(n, 512 * 7 * 7).astype(jnp.bfloat16)
    (w1, b1), (w2, b2), (w3, b3) = params["fcs"]
    xf = linear(xf, w1, b1, apply_relu=True, out_dtype=jnp.bfloat16)
    # TODO(synk): nn.Dropout treated as identity (eval-mode semantics).
    xf = linear(xf, w2, b2, apply_relu=True, out_dtype=jnp.bfloat16)
    xf = linear(xf, w3, b3, apply_relu=False, out_dtype=jnp.float32)
    return xf


if __name__ == "__main__":
    num_classes = 10
    key = jax.random.PRNGKey(0)
    pkey, xkey = jax.random.split(key)
    params = init_params(pkey, num_classes)
    x = jax.random.normal(xkey, (2, 3, 32, 32), jnp.float32)   # small NCHW input
    out = vgg19_forward(params, x)
    out = jax.block_until_ready(out)
    assert out.shape == (2, num_classes), out.shape
    assert out.dtype == jnp.float32
    print("KERNEL_OK")
</pallas_src>

<mosaic_0001>
module attributes {stable_mosaic.version = 11 : i64} {
  func.func @_patch_matmul_relu_kernel(%arg0: i32, %arg1: i32, %arg2: memref<1x32x32x27xbf16, #tpu.memory_space<vmem>>, %arg3: memref<27x64xbf16, #tpu.memory_space<vmem>>, %arg4: memref<1x64xf32, #tpu.memory_space<vmem>>, %arg5: memref<1x32x32x64xbf16, #tpu.memory_space<vmem>>) attributes {dimension_semantics = [#tpu.dimension_semantics<parallel>, #tpu.dimension_semantics<parallel>], iteration_bounds = array<i64: 2, 1>, scalar_prefetch = 0 : i64, scratch_operands = 0 : i64, tpu.core_type = #tpu.core_type<tc>, window_params = [{transform_indices = @transform_0, window_bounds = array<i64: 1, 32, 32, 27>}, {pipeline_mode = #tpu.pipeline_mode<synchronous>, transform_indices = @transform_1, window_bounds = array<i64: 27, 64>}, {pipeline_mode = #tpu.pipeline_mode<synchronous>, transform_indices = @transform_2, window_bounds = array<i64: 1, 64>}, {transform_indices = @transform_3, window_bounds = array<i64: 1, 32, 32, 64>}]} {
    %c0 = arith.constant 0 : index
    %c0_0 = arith.constant 0 : index
    %c0_1 = arith.constant 0 : index
    %c0_2 = arith.constant 0 : index
    %0 = vector.load %arg2[%c0, %c0_0, %c0_1, %c0_2] : memref<1x32x32x27xbf16, #tpu.memory_space<vmem>>, vector<1x32x32x27xbf16>
    %1 = vector.shape_cast %0 : vector<1x32x32x27xbf16> to vector<32x32x27xbf16>
    %2 = vector.shape_cast %1 : vector<32x32x27xbf16> to vector<1024x27xbf16>
    %c0_3 = arith.constant 0 : index
    %c0_4 = arith.constant 0 : index
    %3 = vector.load %arg3[%c0_3, %c0_4] : memref<27x64xbf16, #tpu.memory_space<vmem>>, vector<27x64xbf16>
    %cst = arith.constant dense<0.000000e+00> : vector<1024x64xf32>
    %4 = tpu.matmul %2, %3, %cst {dimension_numbers = #tpu.dot_dimension_numbers<[1], [0], [0], [1], [0, 0, 1, 1], [], []>} : vector<1024x27xbf16>, vector<27x64xbf16>, vector<1024x64xf32> -> vector<1024x64xf32>
    %c0_5 = arith.constant 0 : index
    %c0_6 = arith.constant 0 : index
    %5 = vector.load %arg4[%c0_5, %c0_6] : memref<1x64xf32, #tpu.memory_space<vmem>>, vector<1x64xf32>
    %6 = vector.broadcast %5 : vector<1x64xf32> to vector<1024x64xf32>
    %7 = arith.addf %4, %6 : vector<1024x64xf32>
    %cst_7 = arith.constant 0.000000e+00 : f32
    %8 = vector.broadcast %cst_7 : f32 to vector<1024x64xf32>
    %9 = arith.maximumf %7, %8 : vector<1024x64xf32>
    %10 = vector.shape_cast %9 : vector<1024x64xf32> to vector<32x32x64xf32>
    %11 = arith.truncf %10 : vector<32x32x64xf32> to vector<32x32x64xbf16>
    %c0_8 = arith.constant 0 : index
    %c0_9 = arith.constant 0 : index
    %c0_10 = arith.constant 0 : index
    %c0_11 = arith.constant 0 : index
    %12 = vector.load %arg5[%c0_8, %c0_9, %c0_10, %c0_11] : memref<1x32x32x64xbf16, #tpu.memory_space<vmem>>, vector<1x32x32x64xbf16>
    %13 = vector.shape_cast %12 : vector<1x32x32x64xbf16> to vector<32x32x64xbf16>
    %14 = vector.shape_cast %11 : vector<32x32x64xbf16> to vector<1x32x32x64xbf16>
    tpu.vector_store %arg5[%c0_8, %c0_9, %c0_10, %c0_11], %14 {strides = array<i32>} : memref<1x32x32x64xbf16, #tpu.memory_space<vmem>>, vector<1x32x32x64xbf16>,
    return
  }
  func.func @transform_0(%arg0: i32, %arg1: i32) -> (i32, i32, i32, i32) {
    %c0_i32 = arith.constant 0 : i32
    %c0_i32_0 = arith.constant 0 : i32
    %c0_i32_1 = arith.constant 0 : i32
    return %arg0, %arg1, %c0_i32, %c0_i32_0 : i32, i32, i32, i32
  }
  func.func @transform_1(%arg0: i32, %arg1: i32) -> (i32, i32) {
    %c0_i32 = arith.constant 0 : i32
    %c0_i32_0 = arith.constant 0 : i32
    %c0_i32_1 = arith.constant 0 : i32
    return %c0_i32, %c0_i32_0 : i32, i32
  }
  func.func @transform_2(%arg0: i32, %arg1: i32) -> (i32, i32) {
    %c0_i32 = arith.constant 0 : i32
    %c0_i32_0 = arith.constant 0 : i32
    %c0_i32_1 = arith.constant 0 : i32
    return %c0_i32, %c0_i32_0 : i32, i32
  }
  func.func @transform_3(%arg0: i32, %arg1: i32) -> (i32, i32, i32, i32) {
    %c0_i32 = arith.constant 0 : i32
    %c0_i32_0 = arith.constant 0 : i32
    %c0_i32_1 = arith.constant 0 : i32
    return %arg0, %arg1, %c0_i32, %c0_i32_0 : i32, i32, i32, i32
  }
}

</mosaic_0001>

<bundles_post_ra>
// kernel: tpu_custom_call.1
= control target key start
LH: loop header
LB: loop body
LE: loop exit
PB: predicated region body
PF: predicated region fallthrough
CT: control target
= control target key end

     0   :  { %8 = vsyncpa [#allocation3], 0  ;;  %s3772_s0 = inlined_call_operand.vmem [shape: bf16[2,32,32,27], index: 0, kind: input, shape index: {}]   ;;  %s3773_s1 = inlined_call_operand.vmem [shape: bf16[27,64], index: 1, kind: input, shape index: {}]   ;;  %s3774_s2 = inlined_call_operand.vmem [shape: f32[1,64], index: 2, kind: input, shape index: {}]   ;;  %s3775_s3 = inlined_call_operand.hbm [shape: bf16[2,32,32,64], index: 3, kind: output, shape index: {}]  }
   0x1   :  { %10 = vsyncpa [#allocation3 + $0x1], 0  ;;  %s3120_s12 = smov 0   ;;  %s3122_s13 = smov 0  }
   0x2   :  { %s3124_s14 = smov 0   ;;  %s3126_s15 = smov 0  }
   0x3   :  { %s3128_s16 = smov 0   ;;  %s3130_s17 = smov 0  }
   0x4 LB: > { %s2287_s18 = sadd.s32 4294967295, %s3094_s17   ;;  %s2288_s19 = sadd.s32 4294967294, %s3094_s17   ;;  %s3094_s17 = sphi %s3130_s17, %s16_s17   ;;  %s3090_s16 = sphi %s3128_s16, %s3782_s16   ;;  %s3086_s15 = sphi %s3126_s15, %s3781_s15   ;;  %s3082_s14 = sphi %s3124_s14, %s3780_s14   ;;  %s3078_s13 = sphi %s3122_s13, %s3779_s13   ;;  %s3074_s12 = sphi %s3120_s12, %s3778_s12  }
   0x5   : > { %s28_s20 = sadd.s32 1, %s3090_s16  ;;  %s107_s21 = sadd.s32 1, %s3082_s14 }
   0x6   : > { %p30_p0 = scmp.ge.s32.totalorder %s28_s20, 2  ;;  %p117_p1 = scmp.ne.s32.totalorder %s3082_s14, %s3078_s13 }
   0x7   : > { %p118_p2 = scmp.eq.s32.totalorder %s2287_s18, 1  ;;  %p123_p3 = scmp.ne.s32.totalorder %s3078_s13, %s3074_s12 }
   0x8   : > { %s3784_s20 = smov (%p30_p0, %s28_s20), 0  ;;  %p124_p5 = scmp.eq.s32.totalorder %s2288_s19, 1 }
   0x9   : > { %p3160_p4 = por %p118_p2, %p117_p1  ;;  %s102_s23 = ssub.s32 %s3090_s16, %s3784_s20 }
   0xa   : > { %p2291_p6 = scmp.ge.s32.totalorder %s3094_s17, 1  ;;  %p105_p7 = scmp.eq.s32.totalorder %s102_s23, 0 }
   0xb   : > { %p3167_p8 = por %p124_p5, %p123_p3  ;;  %p162_p9 = scmp.lt.s32.totalorder %s3094_s17, 3 }
   0xc   : > { %s3173_s25 = scalar_select %p105_p7, %s3082_s14, %s107_s21  }
   0xd   : > { %p163_p10 = pnand %p2291_p6, %p162_p9 }
   0xe   : > { %v2949_v0 = vld [vmem:[%s3773_s1] sm:$0xff] (!%p163_p10)   ;;  %vm867_vm0 = vcmask (!%p163_p10), 1044480   ;;  %v2950_v1 = vld [vmem:[%s3773_s1 + $0x8] sm:$0x3f] (!%p163_p10)   ;;  %vm868_vm1 = vcmask (!%p163_p10), 1045504   ;;  %p192_p11 = scmp.lt.s32.totalorder (!%p163_p10), %s3086_s15, 1 }
   0xf   : > { %166 = sbr.rel (%p163_p10) target bundleno = 385 (0x181), region = 32  ;;  %2755 = vmatprep.subr.bf16.mxu0 (!%p163_p10), %v2949_v0  ;;  %2887 = vmatprep.subr.bf16.mxu1 (!%p163_p10), %v2949_v0  ;;  %v3096_v2 = vmov (!%p163_p10), 65535   ;;  %vm674_vm2 = vcmask (!%p163_p10), 220160   ;;  %s188_s8 = sand.u32 (!%p163_p10), 1, %s3078_s13   ;;  %vm2059_vm3 = vcmask (!%p163_p10), 519168  }
  0x10   : > { %2756 = vmatpush3.bf16.msra.mxu0 (!%p163_p10), %v2949_v0  ;;  %2889 = vmatpush3.bf16.msra.mxu1 (!%p163_p10), %v2949_v0  ;;  %v869_v3 = vsel (!%p163_p10), %vm867_vm0, 4294967295, %v3096_v2  ;;  %s2292_s11 = sshll.u32 (!%p163_p10), %s188_s8, 9  ;;  %s2688_s23 = sshll.u32 (!%p163_p10), %s3086_s15, 13 }
  0x11   : > { %v870_v4 = vsel (!%p163_p10), %vm868_vm1, %v869_v3, 0  ;;  %s3332_s18 = scalar_lea.vmem (!%p163_p10), [#allocation2], %s2292_s11  ;;  %s3710_s28 = scalar_lea.hbm (!%p163_p10), %s3775_s3, %s2688_s23 }
  0x12   : > { %v872_v5 = vand.u32 (!%p163_p10), %v2950_v1, %v870_v4  ;;  %s2205_s26 = sshll.u32 (!%p163_p10), %s3332_s18, 4  ;;  %s3726_s29 = scalar_lea.sflag (!%p163_p10), [#allocation3], %s188_s8  ;;  %s3712_s26 = int_to_ptr.vmem [resolvable:$true] %s2205_s26 }
  0x14   : > { %2757 = vmatprep.subr.bf16.mxu0 (!%p163_p10), %v872_v5  ;;  %2888 = vmatprep.subr.bf16.mxu1 (!%p163_p10), %v872_v5 }
  0x15   : > { %2758 = vmatpush3.bf16.msra.mxu0 (!%p163_p10), %v872_v5  ;;  %2890 = vmatpush3.bf16.msra.mxu1 (!%p163_p10), %v872_v5 }
  0x16   : > { %s193_s30 = scalar_select %p192_p11, %s3086_s15, 1 }
  0x18   : > { %s2559_s4 = sshll.u32 %s193_s30, 9  ;;  %s3016_s30 = scalar_lea.vmem %s3712_s26, 8192 }
  0x19   : > { %s3186_s7 = scalar_lea.vmem %s3772_s0, %s2559_s4  ;;  %p3017_p12 = scmp.ne.s32.totalorder %s3712_s26, %s3016_s30 }
  0x1a   : > { %v2951_v6 = vld [vmem:[%s3186_s7] sm:$0xff]   ;;  %v2953_v8 = vld [vmem:[%s3186_s7 + $0x8] sm:$0xff]   ;;  %v2955_v10 = vld [vmem:[%s3186_s7 + $0x10] sm:$0xff]   ;;  %s3097_s4 = smov [#allocation2]  }
  0x1b   : > { %v2952_v7 = vld [vmem:[%s3186_s7 + $0x100] sm:$0xff]   ;;  %2759 = vmatprep.mubr.msk.bf16.mxu0 %vm674_vm2, %v2951_v6  ;;  %v2954_v9 = vld [vmem:[%s3186_s7 + $0x108] sm:$0xff]   ;;  %v2956_v11 = vld [vmem:[%s3186_s7 + $0x110] sm:$0xff]   ;;  %p3018_p13 = pnand %p3017_p12, %p3160_p4  ;;  %s3020_s5 = sshll.u32 %s3097_s4, 4  ;;  %s3021_s5 = int_to_ptr.vmem [resolvable:$false] %s3020_s5 }
  0x1c   : > { %2823 = vmatprep.mubr.msk.bf16.mxu1 %vm674_vm2, %v2952_v7  ;;  %2760 = vmatmul.mubr.msk.bf16.vlgmr.msra.gmra.mrb[0].mxu0 %vm674_vm2, %v2953_v8  ;;  %v2957_v12 = vld [vmem:[%s3186_s7 + $0x18] sm:$0xff]   ;;  %v2959_v14 = vld [vmem:[%s3186_s7 + $0x20] sm:$0xff]   ;;  %v2961_v16 = vld [vmem:[%s3186_s7 + $0x28] sm:$0xff]   ;;  %s3022_s6 = scalar_lea.vmem %s3021_s5, 16384  ;;  %p3023_p1 = scmp.lt.s32.totalorder %s3712_s26, %s3021_s5 }
  0x1d   : > { %2824 = vmatmul.mubr.msk.bf16.vlgmr.msra.gmra.mrb[0].mxu1 %vm674_vm2, %v2954_v9  ;;  %2763 = vmatprep.mubr.msk.bf16.mxu0 %vm674_vm2, %v2955_v10  ;;  %v2958_v13 = vld [vmem:[%s3186_s7 + $0x118] sm:$0xff]   ;;  %v2960_v15 = vld [vmem:[%s3186_s7 + $0x120] sm:$0xff]   ;;  %v2962_v17 = vld [vmem:[%s3186_s7 + $0x128] sm:$0xff]   ;;  %p3019_p0 = pneg %p3018_p13  ;;  %p3024_p2 = scmp.lt.s32.totalorder %s3022_s6, %s3016_s30 }
  0x1e   : > { %2827 = vmatprep.mubr.msk.bf16.mxu1 %vm674_vm2, %v2956_v11  ;;  %v2963_v18 = vld [vmem:[%s3186_s7 + $0x30] sm:$0xff]   ;;  %v2965_v20 = vld [vmem:[%s3186_s7 + $0x38] sm:$0xff]   ;;  %v2967_v22 = vld [vmem:[%s3186_s7 + $0x40] sm:$0xff]  }
  0x1f   : > { %v2964_v19 = vld [vmem:[%s3186_s7 + $0x130] sm:$0xff]   ;;  %v2966_v21 = vld [vmem:[%s3186_s7 + $0x138] sm:$0xff]   ;;  %v2968_v23 = vld [vmem:[%s3186_s7 + $0x140] sm:$0xff]   ;;  %p3025_p3 = por %p3024_p2, %p3023_p1 }
  0x20   : > { %v2969_v24 = vld [vmem:[%s3186_s7 + $0x48] sm:$0xff]   ;;  %v2971_v26 = vld [vmem:[%s3186_s7 + $0x50] sm:$0xff]   ;;  %v2973_v28 = vld [vmem:[%s3186_s7 + $0x58] sm:$0xff]  }
  0x21   : > { %v2970_v25 = vld [vmem:[%s3186_s7 + $0x148] sm:$0xff]   ;;  %v2972_v27 = vld [vmem:[%s3186_s7 + $0x150] sm:$0xff]   ;;  %v2974_v29 = vld [vmem:[%s3186_s7 + $0x158] sm:$0xff]   ;;  %p3026_p5 = pnand %p3025_p3, %p3019_p0 }
  0x22   : > { %v2975_v30 = vld [vmem:[%s3186_s7 + $0x60] sm:$0xff]   ;;  %v2977_v32 = vld [vmem:[%s3186_s7 + $0x68] sm:$0xff]   ;;  %v2979_v34 = vld [vmem:[%s3186_s7 + $0x70] sm:$0xff]  }
  0x23   : > { %v2976_v31 = vld [vmem:[%s3186_s7 + $0x160] sm:$0xff]   ;;  %v2978_v33 = vld [vmem:[%s3186_s7 + $0x168] sm:$0xff]   ;;  %v2980_v35 = vld [vmem:[%s3186_s7 + $0x170] sm:$0xff]  }
  0x24   : > { %2764 = vmatmul.mubr.msk.bf16.gmra.mrb[4].mxu0 %vm674_vm2, %v2957_v12  ;;  %v2981_v36 = vld [vmem:[%s3186_s7 + $0x78] sm:$0xff]   ;;  %v2983_v38 = vld [vmem:[%s3186_s7 + $0x80] sm:$0xff]   ;;  %v2985_v40 = vld [vmem:[%s3186_s7 + $0x88] sm:$0xff]  }
  0x25   : > { %2828 = vmatmul.mubr.msk.bf16.gmra.mrb[4].mxu1 %vm674_vm2, %v2958_v13  ;;  %2767 = vmatprep.mubr.msk.bf16.mxu0 %vm674_vm2, %v2959_v14  ;;  %v2982_v37 = vld [vmem:[%s3186_s7 + $0x178] sm:$0xff]   ;;  %v2984_v39 = vld [vmem:[%s3186_s7 + $0x180] sm:$0xff]   ;;  %v2986_v41 = vld [vmem:[%s3186_s7 + $0x188] sm:$0xff]  }
  0x26   : > { %2831 = vmatprep.mubr.msk.bf16.mxu1 %vm674_vm2, %v2960_v15  ;;  %v2987_v42 = vld [vmem:[%s3186_s7 + $0x90] sm:$0xff]   ;;  %v2989_v44 = vld [vmem:[%s3186_s7 + $0x98] sm:$0xff]   ;;  %v2991_v46 = vld [vmem:[%s3186_s7 + $0xa0] sm:$0xff]  }
  0x27   : > { %v2988_v43 = vld [vmem:[%s3186_s7 + $0x190] sm:$0xff]   ;;  %v2990_v45 = vld [vmem:[%s3186_s7 + $0x198] sm:$0xff]   ;;  %v2992_v47 = vld [vmem:[%s3186_s7 + $0x1a0] sm:$0xff]  }
  0x28   : > { %v2993_v48 = vld [vmem:[%s3186_s7 + $0xa8] sm:$0xff]   ;;  %v2995_v50 = vld [vmem:[%s3186_s7 + $0xb0] sm:$0xff]   ;;  %v2997_v52 = vld [vmem:[%s3186_s7 + $0xb8] sm:$0xff]  }
  0x29   : > { %v2994_v49 = vld [vmem:[%s3186_s7 + $0x1a8] sm:$0xff]   ;;  %v2996_v51 = vld [vmem:[%s3186_s7 + $0x1b0] sm:$0xff]   ;;  %v2998_v53 = vld [vmem:[%s3186_s7 + $0x1b8] sm:$0xff]  }
  0x2a   : > { %v2999_v54 = vld [vmem:[%s3186_s7 + $0xc0] sm:$0xff]   ;;  %v3001_v56 = vld [vmem:[%s3186_s7 + $0xc8] sm:$0xff]   ;;  %v3003_v58 = vld [vmem:[%s3186_s7 + $0xd0] sm:$0xff]  }
  0x2b   : > { %v3000_v55 = vld [vmem:[%s3186_s7 + $0x1c0] sm:$0xff]   ;;  %v3002_v57 = vld [vmem:[%s3186_s7 + $0x1c8] sm:$0xff]   ;;  %v3004_v59 = vld [vmem:[%s3186_s7 + $0x1d0] sm:$0xff]  }
  0x2c   : > { %2768 = vmatmul.mubr.msk.bf16.gmra.mrb[8].mxu0 %vm674_vm2, %v2961_v16  ;;  %v3005_v60 = vld [vmem:[%s3186_s7 + $0xd8] sm:$0xff]   ;;  %v3007_v62 = vld [vmem:[%s3186_s7 + $0xe0] sm:$0xff]   ;;  %v3009_v0 = vld [vmem:[%s3186_s7 + $0xe8] sm:$0xff]  }
  0x2d   : > { %2832 = vmatmul.mubr.msk.bf16.gmra.mrb[8].mxu1 %vm674_vm2, %v2962_v17  ;;  %2771 = vmatprep.mubr.msk.bf16.mxu0 %vm674_vm2, %v2963_v18  ;;  %v3006_v61 = vld [vmem:[%s3186_s7 + $0x1d8] sm:$0xff]   ;;  %v3008_v63 = vld [vmem:[%s3186_s7 + $0x1e0] sm:$0xff]   ;;  %v3010_v1 = vld [vmem:[%s3186_s7 + $0x1e8] sm:$0xff]  }
  0x2e   : > { %2835 = vmatprep.mubr.msk.bf16.mxu1 %vm674_vm2, %v2964_v19  ;;  %v3011_v2 = vld [vmem:[%s3186_s7 + $0xf0] sm:$0xff]   ;;  %v3013_v4 = vld [vmem:[%s3186_s7 + $0xf8] sm:$0xff]   ;;  %v3320_v6 = vld [vmem:[%s3774_s2] ss:$0 sm:$0xff] }
  0x2f   : > { %v3012_v3 = vld [vmem:[%s3186_s7 + $0x1f0] sm:$0xff]   ;;  %v3014_v5 = vld [vmem:[%s3186_s7 + $0x1f8] sm:$0xff]  }
  0x34   : > { %2772 = vmatmul.mubr.msk.bf16.gmra.mrb[12].mxu0 %vm674_vm2, %v2965_v20 }
  0x35   : > { %2836 = vmatmul.mubr.msk.bf16.gmra.mrb[12].mxu1 %vm674_vm2, %v2966_v21  ;;  %2775 = vmatprep.mubr.msk.bf16.mxu0 %vm674_vm2, %v2967_v22 }
  0x36   : > { %2839 = vmatprep.mubr.msk.bf16.mxu1 %vm674_vm2, %v2968_v23 }
  0x3c   : > { %2776 = vmatmul.mubr.msk.bf16.gmra.mrb[16].mxu0 %vm674_vm2, %v2969_v24 }
  0x3d   : > { %2840 = vmatmul.mubr.msk.bf16.gmra.mrb[16].mxu1 %vm674_vm2, %v2970_v25  ;;  %2779 = vmatprep.mubr.msk.bf16.mxu0 %vm674_vm2, %v2971_v26 }
  0x3e   : > { %2843 = vmatprep.mubr.msk.bf16.mxu1 %vm674_vm2, %v2972_v27 }
  0x44   : > { %2780 = vmatmul.mubr.msk.bf16.gmra.mrb[20].mxu0 %vm674_vm2, %v2973_v28 }
  0x45   : > { %2844 = vmatmul.mubr.msk.bf16.gmra.mrb[20].mxu1 %vm674_vm2, %v2974_v29  ;;  %2783 = vmatprep.mubr.msk.bf16.mxu0 %vm674_vm2, %v2975_v30 }
  0x46   : > { %2847 = vmatprep.mubr.msk.bf16.mxu1 %vm674_vm2, %v2976_v31 }
  0x4c   : > { %2784 = vmatmul.mubr.msk.bf16.gmra.mrb[24].mxu0 %vm674_vm2, %v2977_v32 }
  0x4d   : > { %2848 = vmatmul.mubr.msk.bf16.gmra.mrb[24].mxu1 %vm674_vm2, %v2978_v33  ;;  %2787 = vmatprep.mubr.msk.bf16.mxu0 %vm674_vm2, %v2979_v34 }
  0x4e   : > { %2851 = vmatprep.mubr.msk.bf16.mxu1 %vm674_vm2, %v2980_v35 }
  0x54   : > { %2788 = vmatmul.mubr.msk.bf16.gmra.mrb[28].mxu0 %vm674_vm2, %v2981_v36 }
  0x55   : > { %2852 = vmatmul.mubr.msk.bf16.gmra.mrb[28].mxu1 %vm674_vm2, %v2982_v37  ;;  %2791 = vmatprep.mubr.msk.bf16.mxu0 %vm674_vm2, %v2983_v38 }
  0x56   : > { %2855 = vmatprep.mubr.msk.bf16.mxu1 %vm674_vm2, %v2984_v39 }
  0x5c   : > { %2792 = vmatmul.mubr.msk.bf16.gmra.mrb[32].mxu0 %vm674_vm2, %v2985_v40 }
  0x5d   : > { %2856 = vmatmul.mubr.msk.bf16.gmra.mrb[32].mxu1 %vm674_vm2, %v2986_v41  ;;  %2795 = vmatprep.mubr.msk.bf16.mxu0 %vm674_vm2, %v2987_v42 }
  0x5e   : > { %2859 = vmatprep.mubr.msk.bf16.mxu1 %vm674_vm2, %v2988_v43 }
  0x64   : > { %2796 = vmatmul.mubr.msk.bf16.gmra.mrb[36].mxu0 %vm674_vm2, %v2989_v44 }
  0x65   : > { %2860 = vmatmul.mubr.msk.bf16.gmra.mrb[36].mxu1 %vm674_vm2, %v2990_v45  ;;  %2799 = vmatprep.mubr.msk.bf16.mxu0 %vm674_vm2, %v2991_v46 }
  0x66   : > { %2863 = vmatprep.mubr.msk.bf16.mxu1 %vm674_vm2, %v2992_v47 }
  0x6c   : > { %2800 = vmatmul.mubr.msk.bf16.gmra.mrb[40].mxu0 %vm674_vm2, %v2993_v48 }
  0x6d   : > { %2864 = vmatmul.mubr.msk.bf16.gmra.mrb[40].mxu1 %vm674_vm2, %v2994_v49  ;;  %2803 = vmatprep.mubr.msk.bf16.mxu0 %vm674_vm2, %v2995_v50 }
  0x6e   : > { %2867 = vmatprep.mubr.msk.bf16.mxu1 %vm674_vm2, %v2996_v51 }
  0x74   : > { %2804 = vmatmul.mubr.msk.bf16.gmra.mrb[44].mxu0 %vm674_vm2, %v2997_v52 }
  0x75   : > { %2868 = vmatmul.mubr.msk.bf16.gmra.mrb[44].mxu1 %vm674_vm2, %v2998_v53  ;;  %2807 = vmatprep.mubr.msk.bf16.mxu0 %vm674_vm2, %v2999_v54 }
  0x76   : > { %2871 = vmatprep.mubr.msk.bf16.mxu1 %vm674_vm2, %v3000_v55 }
  0x7c   : > { %2808 = vmatmul.mubr.msk.bf16.gmra.mrb[48].mxu0 %vm674_vm2, %v3001_v56 }
  0x7d   : > { %2872 = vmatmul.mubr.msk.bf16.gmra.mrb[48].mxu1 %vm674_vm2, %v3002_v57  ;;  %2811 = vmatprep.mubr.msk.bf16.mxu0 %vm674_vm2, %v3003_v58 }
  0x7e   : > { %2875 = vmatprep.mubr.msk.bf16.mxu1 %vm674_vm2, %v3004_v59 }
  0x84   : > { %2812 = vmatmul.mubr.msk.bf16.gmra.mrb[52].mxu0 %vm674_vm2, %v3005_v60 }
  0x85   : > { %2876 = vmatmul.mubr.msk.bf16.gmra.mrb[52].mxu1 %vm674_vm2, %v3006_v61  ;;  %2815 = vmatprep.mubr.msk.bf16.mxu0 %vm674_vm2, %v3007_v62 }
  0x86   : > { %2879 = vmatprep.mubr.msk.bf16.mxu1 %vm674_vm2, %v3008_v63 }
  0x8c   : > { %2816 = vmatmul.mubr.msk.bf16.gmra.mrb[56].mxu0 %vm674_vm2, %v3009_v0 }
  0x8d   : > { %2880 = vmatmul.mubr.msk.bf16.gmra.mrb[56].mxu1 %vm674_vm2, %v3010_v1  ;;  %2819 = vmatprep.mubr.msk.bf16.mxu0 %vm674_vm2, %v3011_v2 }
  0x8e   : > { %2883 = vmatprep.mubr.msk.bf16.mxu1 %vm674_vm2, %v3012_v3 }
  0x94   : > { %2820 = vmatmul.mubr.msk.bf16.gmra.mrb[60].mxu0 %vm674_vm2, %v3013_v4 }
  0x95   : > { %2884 = vmatmul.mubr.msk.bf16.gmra.mrb[60].mxu1 %vm674_vm2, %v3014_v5 }
  0xef   : > { %v2761_v7 = vpop.f32.mrb[0].mxu0 }
  0xf0   : > { %v917_v8 = vadd.f32 %v2761_v7, %v3320_v6  ;;  %v2825_v9 = vpop.f32.mrb[0].mxu1  ;;  %v908_v10 = vpop.f32.mrb[1].mxu0 }
  0xf1   : > { %v1173_v11 = vadd.f32 %v2825_v9, %v3320_v6  ;;  %v909_v12 = vadd.f32 %v3320_v6, %v908_v10  ;;  %v1164_v13 = vpop.f32.mrb[1].mxu1  ;;  %v2762_v14 = vpop.f32.mrb[2].mxu0 }
  0xf2   : > { %v1421_v15 = vmax.f32 %v917_v8, 0.0  ;;  %v1165_v16 = vadd.f32 %v3320_v6, %v1164_v13  ;;  %v920_v17 = vadd.f32 %v2762_v14, %v3320_v6  ;;  %v2826_v18 = vpop.f32.mrb[2].mxu1  ;;  %v911_v19 = vpop.f32.mrb[3].mxu0 }
  0xf3   : > { %v1485_v20 = vmax.f32 %v1173_v11, 0.0  ;;  %v1419_v21 = vmax.f32 %v909_v12, 0.0  ;;  %v1176_v22 = vadd.f32 %v2826_v18, %v3320_v6  ;;  %v912_v23 = vadd.f32 %v3320_v6, %v911_v19  ;;  %v1167_v24 = vpop.f32.mrb[3].mxu1 }
  0xf4   : > { %v2562_v25 = vpack.c.bf16 %v1421_v15, %v1421_v15  ;;  %v1483_v26 = vmax.f32 %v1165_v16, 0.0  ;;  %v1422_v27 = vmax.f32 %v920_v17, 0.0  ;;  %v1168_v28 = vadd.f32 %v3320_v6, %v1167_v24 }
  0xf5   : > { %v2626_v29 = vpack.c.bf16 %v1485_v20, %v1485_v20  ;;  %v2560_v30 = vpack.c.bf16 %v1419_v21, %v1419_v21  ;;  %v1486_v31 = vmax.f32 %v1176_v22, 0.0  ;;  %v1420_v32 = vmax.f32 %v912_v23, 0.0 }
  0xf6   : > { %2062 = vst.msk [vmem:[%s3332_s18 + $0x8] sm:$0xf] %vm2059_vm3, %v2562_v25  ;;  %v2624_v33 = vpack.c.bf16 %v1483_v26, %v1483_v26  ;;  %v2563_v34 = vpack.c.bf16 %v1422_v27, %v1422_v27  ;;  %v1484_v35 = vmax.f32 %v1168_v28, 0.0 }
  0xf7   : > { %2126 = vst.msk [vmem:[%s3332_s18 + $0x108] sm:$0xf] %vm2059_vm3, %v2626_v29  ;;  %2060 = vst.msk [vmem:[%s3332_s18] sm:$0xf] %vm2059_vm3, %v2560_v30  ;;  %v2627_v36 = vpack.c.bf16 %v1486_v31, %v1486_v31  ;;  %v2561_v37 = vpack.c.bf16 %v1420_v32, %v1420_v32  ;;  %v2765_v38 = vpop.f32.mrb[4].mxu0 }
  0xf8   : > { %2124 = vst.msk [vmem:[%s3332_s18 + $0x100] sm:$0xf] %vm2059_vm3, %v2624_v33  ;;  %2063 = vst.msk [vmem:[%s3332_s18 + $0xc] sm:$0xf] %vm2059_vm3, %v2563_v34  ;;  %v2625_v39 = vpack.c.bf16 %v1484_v35, %v1484_v35  ;;  %v933_v40 = vadd.f32 %v2765_v38, %v3320_v6  ;;  %v2829_v41 = vpop.f32.mrb[4].mxu1  ;;  %v924_v42 = vpop.f32.mrb[5].mxu0 }
  0xf9   : > { %2127 = vst.msk [vmem:[%s3332_s18 + $0x10c] sm:$0xf] %vm2059_vm3, %v2627_v36  ;;  %2061 = vst.msk [vmem:[%s3332_s18 + $0x4] sm:$0xf] %vm2059_vm3, %v2561_v37  ;;  %v1189_v43 = vadd.f32 %v2829_v41, %v3320_v6  ;;  %v925_v44 = vadd.f32 %v3320_v6, %v924_v42  ;;  %v1180_v45 = vpop.f32.mrb[5].mxu1  ;;  %v2766_v46 = vpop.f32.mrb[6].mxu0 }
  0xfa   : > { %2125 = vst.msk [vmem:[%s3332_s18 + $0x104] sm:$0xf] %vm2059_vm3, %v2625_v39  ;;  %v1425_v47 = vmax.f32 %v933_v40, 0.0  ;;  %v1181_v48 = vadd.f32 %v3320_v6, %v1180_v45  ;;  %v936_v49 = vadd.f32 %v2766_v46, %v3320_v6  ;;  %v2830_v50 = vpop.f32.mrb[6].mxu1  ;;  %v927_v51 = vpop.f32.mrb[7].mxu0 }
  0xfb   : > { %v1489_v52 = vmax.f32 %v1189_v43, 0.0  ;;  %v1423_v53 = vmax.f32 %v925_v44, 0.0  ;;  %v1192_v54 = vadd.f32 %v2830_v50, %v3320_v6  ;;  %v928_v55 = vadd.f32 %v3320_v6, %v927_v51  ;;  %v1183_v56 = vpop.f32.mrb[7].mxu1 }
  0xfc   : > { %v2566_v57 = vpack.c.bf16 %v1425_v47, %v1425_v47  ;;  %v1487_v58 = vmax.f32 %v1181_v48, 0.0  ;;  %v1426_v59 = vmax.f32 %v936_v49, 0.0  ;;  %v1184_v60 = vadd.f32 %v3320_v6, %v1183_v56 }
  0xfd   : > { %v2630_v61 = vpack.c.bf16 %v1489_v52, %v1489_v52  ;;  %v2564_v62 = vpack.c.bf16 %v1423_v53, %v1423_v53  ;;  %v1490_v63 = vmax.f32 %v1192_v54, 0.0  ;;  %v1424_v0 = vmax.f32 %v928_v55, 0.0 }
  0xfe   : > { %2066 = vst.msk [vmem:[%s3332_s18 + $0x18] sm:$0xf] %vm2059_vm3, %v2566_v57  ;;  %v2628_v1 = vpack.c.bf16 %v1487_v58, %v1487_v58  ;;  %v2567_v2 = vpack.c.bf16 %v1426_v59, %v1426_v59  ;;  %v1488_v3 = vmax.f32 %v1184_v60, 0.0 }
  0xff   : > { %2130 = vst.msk [vmem:[%s3332_s18 + $0x118] sm:$0xf] %vm2059_vm3, %v2630_v61  ;;  %2064 = vst.msk [vmem:[%s3332_s18 + $0x10] sm:$0xf] %vm2059_vm3, %v2564_v62  ;;  %v2631_v4 = vpack.c.bf16 %v1490_v63, %v1490_v63  ;;  %v2565_v5 = vpack.c.bf16 %v1424_v0, %v1424_v0  ;;  %v2769_v7 = vpop.f32.mrb[8].mxu0 }
 0x100   : > { %2128 = vst.msk [vmem:[%s3332_s18 + $0x110] sm:$0xf] %vm2059_vm3, %v2628_v1  ;;  %2067 = vst.msk [vmem:[%s3332_s18 + $0x1c] sm:$0xf] %vm2059_vm3, %v2567_v2  ;;  %v2629_v8 = vpack.c.bf16 %v1488_v3, %v1488_v3  ;;  %v949_v9 = vadd.f32 %v2769_v7, %v3320_v6  ;;  %v2833_v10 = vpop.f32.mrb[8].mxu1  ;;  %v940_v11 = vpop.f32.mrb[9].mxu0 }
 0x101   : > { %2131 = vst.msk [vmem:[%s3332_s18 + $0x11c] sm:$0xf] %vm2059_vm3, %v2631_v4  ;;  %2065 = vst.msk [vmem:[%s3332_s18 + $0x14] sm:$0xf] %vm2059_vm3, %v2565_v5  ;;  %v1205_v12 = vadd.f32 %v2833_v10, %v3320_v6  ;;  %v941_v13 = vadd.f32 %v3320_v6, %v940_v11  ;;  %v1196_v14 = vpop.f32.mrb[9].mxu1  ;;  %v2770_v15 = vpop.f32.mrb[10].mxu0 }
 0x102   : > { %2129 = vst.msk [vmem:[%s3332_s18 + $0x114] sm:$0xf] %vm2059_vm3, %v2629_v8  ;;  %v1429_v16 = vmax.f32 %v949_v9, 0.0  ;;  %v1197_v17 = vadd.f32 %v3320_v6, %v1196_v14  ;;  %v952_v18 = vadd.f32 %v2770_v15, %v3320_v6  ;;  %v2834_v19 = vpop.f32.mrb[10].mxu1  ;;  %v943_v20 = vpop.f32.mrb[11].mxu0 }
 0x103   : > { %v1493_v21 = vmax.f32 %v1205_v12, 0.0  ;;  %v1427_v22 = vmax.f32 %v941_v13, 0.0  ;;  %v1208_v23 = vadd.f32 %v2834_v19, %v3320_v6  ;;  %v944_v24 = vadd.f32 %v3320_v6, %v943_v20  ;;  %v1199_v25 = vpop.f32.mrb[11].mxu1 }
 0x104   : > { %v2570_v26 = vpack.c.bf16 %v1429_v16, %v1429_v16  ;;  %v1491_v27 = vmax.f32 %v1197_v17, 0.0  ;;  %v1430_v28 = vmax.f32 %v952_v18, 0.0  ;;  %v1200_v29 = vadd.f32 %v3320_v6, %v1199_v25 }
 0x105   : > { %v2634_v30 = vpack.c.bf16 %v1493_v21, %v1493_v21  ;;  %v2568_v31 = vpack.c.bf16 %v1427_v22, %v1427_v22  ;;  %v1494_v32 = vmax.f32 %v1208_v23, 0.0  ;;  %v1428_v33 = vmax.f32 %v944_v24, 0.0 }
 0x106   : > { %2070 = vst.msk [vmem:[%s3332_s18 + $0x28] sm:$0xf] %vm2059_vm3, %v2570_v26  ;;  %v2632_v34 = vpack.c.bf16 %v1491_v27, %v1491_v27  ;;  %v2571_v35 = vpack.c.bf16 %v1430_v28, %v1430_v28  ;;  %v1492_v36 = vmax.f32 %v1200_v29, 0.0 }
 0x107   : > { %2134 = vst.msk [vmem:[%s3332_s18 + $0x128] sm:$0xf] %vm2059_vm3, %v2634_v30  ;;  %2068 = vst.msk [vmem:[%s3332_s18 + $0x20] sm:$0xf] %vm2059_vm3, %v2568_v31  ;;  %v2635_v37 = vpack.c.bf16 %v1494_v32, %v1494_v32  ;;  %v2569_v38 = vpack.c.bf16 %v1428_v33, %v1428_v33  ;;  %v2773_v39 = vpop.f32.mrb[12].mxu0 }
 0x108   : > { %2132 = vst.msk [vmem:[%s3332_s18 + $0x120] sm:$0xf] %vm2059_vm3, %v2632_v34  ;;  %2071 = vst.msk [vmem:[%s3332_s18 + $0x2c] sm:$0xf] %vm2059_vm3, %v2571_v35  ;;  %v2633_v40 = vpack.c.bf16 %v1492_v36, %v1492_v36  ;;  %v965_v41 = vadd.f32 %v2773_v39, %v3320_v6  ;;  %v2837_v42 = vpop.f32.mrb[12].mxu1  ;;  %v956_v43 = vpop.f32.mrb[13].mxu0 }
 0x109   : > { %2135 = vst.msk [vmem:[%s3332_s18 + $0x12c] sm:$0xf] %vm2059_vm3, %v2635_v37  ;;  %2069 = vst.msk [vmem:[%s3332_s18 + $0x24] sm:$0xf] %vm2059_vm3, %v2569_v38  ;;  %v1221_v44 = vadd.f32 %v2837_v42, %v3320_v6  ;;  %v957_v45 = vadd.f32 %v3320_v6, %v956_v43  ;;  %v1212_v46 = vpop.f32.mrb[13].mxu1  ;;  %v2774_v47 = vpop.f32.mrb[14].mxu0 }
 0x10a   : > { %2133 = vst.msk [vmem:[%s3332_s18 + $0x124] sm:$0xf] %vm2059_vm3, %v2633_v40  ;;  %v1433_v48 = vmax.f32 %v965_v41, 0.0  ;;  %v1213_v49 = vadd.f32 %v3320_v6, %v1212_v46  ;;  %v968_v50 = vadd.f32 %v2774_v47, %v3320_v6  ;;  %v2838_v51 = vpop.f32.mrb[14].mxu1  ;;  %v959_v52 = vpop.f32.mrb[15].mxu0 }
 0x10b   : > { %v1497_v53 = vmax.f32 %v1221_v44, 0.0  ;;  %v1431_v54 = vmax.f32 %v957_v45, 0.0  ;;  %v1224_v55 = vadd.f32 %v2838_v51, %v3320_v6  ;;  %v960_v56 = vadd.f32 %v3320_v6, %v959_v52  ;;  %v1215_v57 = vpop.f32.mrb[15].mxu1 }
 0x10c   : > { %v2574_v58 = vpack.c.bf16 %v1433_v48, %v1433_v48  ;;  %v1495_v59 = vmax.f32 %v1213_v49, 0.0  ;;  %v1434_v60 = vmax.f32 %v968_v50, 0.0  ;;  %v1216_v61 = vadd.f32 %v3320_v6, %v1215_v57 }
 0x10d   : > { %v2638_v62 = vpack.c.bf16 %v1497_v53, %v1497_v53  ;;  %v2572_v63 = vpack.c.bf16 %v1431_v54, %v1431_v54  ;;  %v1498_v0 = vmax.f32 %v1224_v55, 0.0  ;;  %v1432_v1 = vmax.f32 %v960_v56, 0.0 }
 0x10e   : > { %2074 = vst.msk [vmem:[%s3332_s18 + $0x38] sm:$0xf] %vm2059_vm3, %v2574_v58  ;;  %v2636_v2 = vpack.c.bf16 %v1495_v59, %v1495_v59  ;;  %v2575_v3 = vpack.c.bf16 %v1434_v60, %v1434_v60  ;;  %v1496_v4 = vmax.f32 %v1216_v61, 0.0 }
 0x10f   : > { %2138 = vst.msk [vmem:[%s3332_s18 + $0x138] sm:$0xf] %vm2059_vm3, %v2638_v62  ;;  %2072 = vst.msk [vmem:[%s3332_s18 + $0x30] sm:$0xf] %vm2059_vm3, %v2572_v63  ;;  %v2639_v5 = vpack.c.bf16 %v1498_v0, %v1498_v0  ;;  %v2573_v7 = vpack.c.bf16 %v1432_v1, %v1432_v1  ;;  %v2777_v8 = vpop.f32.mrb[16].mxu0 }
 0x110   : > { %2136 = vst.msk [vmem:[%s3332_s18 + $0x130] sm:$0xf] %vm2059_vm3, %v2636_v2  ;;  %2075 = vst.msk [vmem:[%s3332_s18 + $0x3c] sm:$0xf] %vm2059_vm3, %v2575_v3  ;;  %v2637_v9 = vpack.c.bf16 %v1496_v4, %v1496_v4  ;;  %v981_v10 = vadd.f32 %v2777_v8, %v3320_v6  ;;  %v2841_v11 = vpop.f32.mrb[16].mxu1  ;;  %v972_v12 = vpop.f32.mrb[17].mxu0 }
 0x111   : > { %2139 = vst.msk [vmem:[%s3332_s18 + $0x13c] sm:$0xf] %vm2059_vm3, %v2639_v5  ;;  %2073 = vst.msk [vmem:[%s3332_s18 + $0x34] sm:$0xf] %vm2059_vm3, %v2573_v7  ;;  %v1237_v13 = vadd.f32 %v2841_v11, %v3320_v6  ;;  %v973_v14 = vadd.f32 %v3320_v6, %v972_v12  ;;  %v1228_v15 = vpop.f32.mrb[17].mxu1  ;;  %v2778_v16 = vpop.f32.mrb[18].mxu0 }
 0x112   : > { %2137 = vst.msk [vmem:[%s3332_s18 + $0x134] sm:$0xf] %vm2059_vm3, %v2637_v9  ;;  %v1437_v17 = vmax.f32 %v981_v10, 0.0  ;;  %v1229_v18 = vadd.f32 %v3320_v6, %v1228_v15  ;;  %v984_v19 = vadd.f32 %v2778_v16, %v3320_v6  ;;  %v2842_v20 = vpop.f32.mrb[18].mxu1  ;;  %v975_v21 = vpop.f32.mrb[19].mxu0 }
 0x113   : > { %v1501_v22 = vmax.f32 %v1237_v13, 0.0  ;;  %v1435_v23 = vmax.f32 %v973_v14, 0.0  ;;  %v1240_v24 = vadd.f32 %v2842_v20, %v3320_v6  ;;  %v976_v25 = vadd.f32 %v3320_v6, %v975_v21  ;;  %v1231_v26 = vpop.f32.mrb[19].mxu1 }
 0x114   : > { %v2578_v27 = vpack.c.bf16 %v1437_v17, %v1437_v17  ;;  %v1499_v28 = vmax.f32 %v1229_v18, 0.0  ;;  %v1438_v29 = vmax.f32 %v984_v19, 0.0  ;;  %v1232_v30 = vadd.f32 %v3320_v6, %v1231_v26 }
 0x115   : > { %v2642_v31 = vpack.c.bf16 %v1501_v22, %v1501_v22  ;;  %v2576_v32 = vpack.c.bf16 %v1435_v23, %v1435_v23  ;;  %v1502_v33 = vmax.f32 %v1240_v24, 0.0  ;;  %v1436_v34 = vmax.f32 %v976_v25, 0.0 }
 0x116   : > { %2078 = vst.msk [vmem:[%s3332_s18 + $0x48] sm:$0xf] %vm2059_vm3, %v2578_v27  ;;  %v2640_v35 = vpack.c.bf16 %v1499_v28, %v1499_v28  ;;  %v2579_v36 = vpack.c.bf16 %v1438_v29, %v1438_v29  ;;  %v1500_v37 = vmax.f32 %v1232_v30, 0.0 }
 0x117   : > { %2142 = vst.msk [vmem:[%s3332_s18 + $0x148] sm:$0xf] %vm2059_vm3, %v2642_v31  ;;  %2076 = vst.msk [vmem:[%s3332_s18 + $0x40] sm:$0xf] %vm2059_vm3, %v2576_v32  ;;  %v2643_v38 = vpack.c.bf16 %v1502_v33, %v1502_v33  ;;  %v2577_v39 = vpack.c.bf16 %v1436_v34, %v1436_v34  ;;  %v2781_v40 = vpop.f32.mrb[20].mxu0 }
 0x118   : > { %2140 = vst.msk [vmem:[%s3332_s18 + $0x140] sm:$0xf] %vm2059_vm3, %v2640_v35  ;;  %2079 = vst.msk [vmem:[%s3332_s18 + $0x4c] sm:$0xf] %vm2059_vm3, %v2579_v36  ;;  %v2641_v41 = vpack.c.bf16 %v1500_v37, %v1500_v37  ;;  %v997_v42 = vadd.f32 %v2781_v40, %v3320_v6  ;;  %v2845_v43 = vpop.f32.mrb[20].mxu1  ;;  %v988_v44 = vpop.f32.mrb[21].mxu0 }
 0x119   : > { %2143 = vst.msk [vmem:[%s3332_s18 + $0x14c] sm:$0xf] %vm2059_vm3, %v2643_v38  ;;  %2077 = vst.msk [vmem:[%s3332_s18 + $0x44] sm:$0xf] %vm2059_vm3, %v2577_v39  ;;  %v1253_v45 = vadd.f32 %v2845_v43, %v3320_v6  ;;  %v989_v46 = vadd.f32 %v3320_v6, %v988_v44  ;;  %v1244_v47 = vpop.f32.mrb[21].mxu1  ;;  %v2782_v48 = vpop.f32.mrb[22].mxu0 }
 0x11a   : > { %2141 = vst.msk [vmem:[%s3332_s18 + $0x144] sm:$0xf] %vm2059_vm3, %v2641_v41  ;;  %v1441_v49 = vmax.f32 %v997_v42, 0.0  ;;  %v1245_v50 = vadd.f32 %v3320_v6, %v1244_v47  ;;  %v1000_v51 = vadd.f32 %v2782_v48, %v3320_v6  ;;  %v2846_v52 = vpop.f32.mrb[22].mxu1  ;;  %v991_v53 = vpop.f32.mrb[23].mxu0 }
 0x11b   : > { %v1505_v54 = vmax.f32 %v1253_v45, 0.0  ;;  %v1439_v55 = vmax.f32 %v989_v46, 0.0  ;;  %v1256_v56 = vadd.f32 %v2846_v52, %v3320_v6  ;;  %v992_v57 = vadd.f32 %v3320_v6, %v991_v53  ;;  %v1247_v58 = vpop.f32.mrb[23].mxu1 }
 0x11c   : > { %v2582_v59 = vpack.c.bf16 %v1441_v49, %v1441_v49  ;;  %v1503_v60 = vmax.f32 %v1245_v50, 0.0  ;;  %v1442_v61 = vmax.f32 %v1000_v51, 0.0  ;;  %v1248_v62 = vadd.f32 %v3320_v6, %v1247_v58 }
 0x11d   : > { %v2646_v63 = vpack.c.bf16 %v1505_v54, %v1505_v54  ;;  %v2580_v0 = vpack.c.bf16 %v1439_v55, %v1439_v55  ;;  %v1506_v1 = vmax.f32 %v1256_v56, 0.0  ;;  %v1440_v2 = vmax.f32 %v992_v57, 0.0 }
 0x11e   : > { %2082 = vst.msk [vmem:[%s3332_s18 + $0x58] sm:$0xf] %vm2059_vm3, %v2582_v59  ;;  %v2644_v3 = vpack.c.bf16 %v1503_v60, %v1503_v60  ;;  %v2583_v4 = vpack.c.bf16 %v1442_v61, %v1442_v61  ;;  %v1504_v5 = vmax.f32 %v1248_v62, 0.0 }
 0x11f   : > { %2146 = vst.msk [vmem:[%s3332_s18 + $0x158] sm:$0xf] %vm2059_vm3, %v2646_v63  ;;  %2080 = vst.msk [vmem:[%s3332_s18 + $0x50] sm:$0xf] %vm2059_vm3, %v2580_v0  ;;  %v2647_v7 = vpack.c.bf16 %v1506_v1, %v1506_v1  ;;  %v2581_v8 = vpack.c.bf16 %v1440_v2, %v1440_v2  ;;  %v2785_v9 = vpop.f32.mrb[24].mxu0 }
 0x120   : > { %2144 = vst.msk [vmem:[%s3332_s18 + $0x150] sm:$0xf] %vm2059_vm3, %v2644_v3  ;;  %2083 = vst.msk [vmem:[%s3332_s18 + $0x5c] sm:$0xf] %vm2059_vm3, %v2583_v4  ;;  %v2645_v10 = vpack.c.bf16 %v1504_v5, %v1504_v5  ;;  %v1013_v11 = vadd.f32 %v2785_v9, %v3320_v6  ;;  %v2849_v12 = vpop.f32.mrb[24].mxu1  ;;  %v1004_v13 = vpop.f32.mrb[25].mxu0 }
 0x121   : > { %2147 = vst.msk [vmem:[%s3332_s18 + $0x15c] sm:$0xf] %vm2059_vm3, %v2647_v7  ;;  %2081 = vst.msk [vmem:[%s3332_s18 + $0x54] sm:$0xf] %vm2059_vm3, %v2581_v8  ;;  %v1269_v14 = vadd.f32 %v2849_v12, %v3320_v6  ;;  %v1005_v15 = vadd.f32 %v3320_v6, %v1004_v13  ;;  %v1260_v16 = vpop.f32.mrb[25].mxu1  ;;  %v2786_v17 = vpop.f32.mrb[26].mxu0 }
 0x122   : > { %2145 = vst.msk [vmem:[%s3332_s18 + $0x154] sm:$0xf] %vm2059_vm3, %v2645_v10  ;;  %v1445_v18 = vmax.f32 %v1013_v11, 0.0  ;;  %v1261_v19 = vadd.f32 %v3320_v6, %v1260_v16  ;;  %v1016_v20 = vadd.f32 %v2786_v17, %v3320_v6  ;;  %v2850_v21 = vpop.f32.mrb[26].mxu1  ;;  %v1007_v22 = vpop.f32.mrb[27].mxu0 }
 0x123   : > { %v1509_v23 = vmax.f32 %v1269_v14, 0.0  ;;  %v1443_v24 = vmax.f32 %v1005_v15, 0.0  ;;  %v1272_v25 = vadd.f32 %v2850_v21, %v3320_v6  ;;  %v1008_v26 = vadd.f32 %v3320_v6, %v1007_v22  ;;  %v1263_v27 = vpop.f32.mrb[27].mxu1 }
 0x124   : > { %v2586_v28 = vpack.c.bf16 %v1445_v18, %v1445_v18  ;;  %v1507_v29 = vmax.f32 %v1261_v19, 0.0  ;;  %v1446_v30 = vmax.f32 %v1016_v20, 0.0  ;;  %v1264_v31 = vadd.f32 %v3320_v6, %v1263_v27 }
 0x125   : > { %v2650_v32 = vpack.c.bf16 %v1509_v23, %v1509_v23  ;;  %v2584_v33 = vpack.c.bf16 %v1443_v24, %v1443_v24  ;;  %v1510_v34 = vmax.f32 %v1272_v25, 0.0  ;;  %v1444_v35 = vmax.f32 %v1008_v26, 0.0 }
 0x126   : > { %2086 = vst.msk [vmem:[%s3332_s18 + $0x68] sm:$0xf] %vm2059_vm3, %v2586_v28  ;;  %v2648_v36 = vpack.c.bf16 %v1507_v29, %v1507_v29  ;;  %v2587_v37 = vpack.c.bf16 %v1446_v30, %v1446_v30  ;;  %v1508_v38 = vmax.f32 %v1264_v31, 0.0 }
 0x127   : > { %2150 = vst.msk [vmem:[%s3332_s18 + $0x168] sm:$0xf] %vm2059_vm3, %v2650_v32  ;;  %2084 = vst.msk [vmem:[%s3332_s18 + $0x60] sm:$0xf] %vm2059_vm3, %v2584_v33  ;;  %v2651_v39 = vpack.c.bf16 %v1510_v34, %v1510_v34  ;;  %v2585_v40 = vpack.c.bf16 %v1444_v35, %v1444_v35  ;;  %v2789_v41 = vpop.f32.mrb[28].mxu0 }
 0x128   : > { %2148 = vst.msk [vmem:[%s3332_s18 + $0x160] sm:$0xf] %vm2059_vm3, %v2648_v36  ;;  %2087 = vst.msk [vmem:[%s3332_s18 + $0x6c] sm:$0xf] %vm2059_vm3, %v2587_v37  ;;  %v2649_v42 = vpack.c.bf16 %v1508_v38, %v1508_v38  ;;  %v1029_v43 = vadd.f32 %v2789_v41, %v3320_v6  ;;  %v2853_v44 = vpop.f32.mrb[28].mxu1  ;;  %v1020_v45 = vpop.f32.mrb[29].mxu0 }
 0x129   : > { %2151 = vst.msk [vmem:[%s3332_s18 + $0x16c] sm:$0xf] %vm2059_vm3, %v2651_v39  ;;  %2085 = vst.msk [vmem:[%s3332_s18 + $0x64] sm:$0xf] %vm2059_vm3, %v2585_v40  ;;  %v1285_v46 = vadd.f32 %v2853_v44, %v3320_v6  ;;  %v1021_v47 = vadd.f32 %v3320_v6, %v1020_v45  ;;  %v1276_v48 = vpop.f32.mrb[29].mxu1  ;;  %v2790_v49 = vpop.f32.mrb[30].mxu0 }
 0x12a   : > { %2149 = vst.msk [vmem:[%s3332_s18 + $0x164] sm:$0xf] %vm2059_vm3, %v2649_v42  ;;  %v1449_v50 = vmax.f32 %v1029_v43, 0.0  ;;  %v1277_v51 = vadd.f32 %v3320_v6, %v1276_v48  ;;  %v1032_v52 = vadd.f32 %v2790_v49, %v3320_v6  ;;  %v2854_v53 = vpop.f32.mrb[30].mxu1  ;;  %v1023_v54 = vpop.f32.mrb[31].mxu0 }
 0x12b   : > { %v1513_v55 = vmax.f32 %v1285_v46, 0.0  ;;  %v1447_v56 = vmax.f32 %v1021_v47, 0.0  ;;  %v1288_v57 = vadd.f32 %v2854_v53, %v3320_v6  ;;  %v1024_v58 = vadd.f32 %v3320_v6, %v1023_v54  ;;  %v1279_v59 = vpop.f32.mrb[31].mxu1 }
 0x12c   : > { %v2590_v60 = vpack.c.bf16 %v1449_v50, %v1449_v50  ;;  %v1511_v61 = vmax.f32 %v1277_v51, 0.0  ;;  %v1450_v62 = vmax.f32 %v1032_v52, 0.0  ;;  %v1280_v63 = vadd.f32 %v3320_v6, %v1279_v59 }
 0x12d   : > { %v2654_v0 = vpack.c.bf16 %v1513_v55, %v1513_v55  ;;  %v2588_v1 = vpack.c.bf16 %v1447_v56, %v1447_v56  ;;  %v1514_v2 = vmax.f32 %v1288_v57, 0.0  ;;  %v1448_v3 = vmax.f32 %v1024_v58, 0.0 }
 0x12e   : > { %2090 = vst.msk [vmem:[%s3332_s18 + $0x78] sm:$0xf] %vm2059_vm3, %v2590_v60  ;;  %v2652_v4 = vpack.c.bf16 %v1511_v61, %v1511_v61  ;;  %v2591_v5 = vpack.c.bf16 %v1450_v62, %v1450_v62  ;;  %v1512_v7 = vmax.f32 %v1280_v63, 0.0 }
 0x12f   : > { %2154 = vst.msk [vmem:[%s3332_s18 + $0x178] sm:$0xf] %vm2059_vm3, %v2654_v0  ;;  %2088 = vst.msk [vmem:[%s3332_s18 + $0x70] sm:$0xf] %vm2059_vm3, %v2588_v1  ;;  %v2655_v8 = vpack.c.bf16 %v1514_v2, %v1514_v2  ;;  %v2589_v9 = vpack.c.bf16 %v1448_v3, %v1448_v3  ;;  %v2793_v10 = vpop.f32.mrb[32].mxu0 }
 0x130   : > { %2152 = vst.msk [vmem:[%s3332_s18 + $0x170] sm:$0xf] %vm2059_vm3, %v2652_v4  ;;  %2091 = vst.msk [vmem:[%s3332_s18 + $0x7c] sm:$0xf] %vm2059_vm3, %v2591_v5  ;;  %v2653_v11 = vpack.c.bf16 %v1512_v7, %v1512_v7  ;;  %v1045_v12 = vadd.f32 %v2793_v10, %v3320_v6  ;;  %v2857_v13 = vpop.f32.mrb[32].mxu1  ;;  %v1036_v14 = vpop.f32.mrb[33].mxu0 }
 0x131   : > { %2155 = vst.msk [vmem:[%s3332_s18 + $0x17c] sm:$0xf] %vm2059_vm3, %v2655_v8  ;;  %2089 = vst.msk [vmem:[%s3332_s18 + $0x74] sm:$0xf] %vm2059_vm3, %v2589_v9  ;;  %v1301_v15 = vadd.f32 %v2857_v13, %v3320_v6  ;;  %v1037_v16 = vadd.f32 %v3320_v6, %v1036_v14  ;;  %v1292_v17 = vpop.f32.mrb[33].mxu1  ;;  %v2794_v18 = vpop.f32.mrb[34].mxu0 }
 0x132   : > { %2153 = vst.msk [vmem:[%s3332_s18 + $0x174] sm:$0xf] %vm2059_vm3, %v2653_v11  ;;  %v1453_v19 = vmax.f32 %v1045_v12, 0.0  ;;  %v1293_v20 = vadd.f32 %v3320_v6, %v1292_v17  ;;  %v1048_v21 = vadd.f32 %v2794_v18, %v3320_v6  ;;  %v2858_v22 = vpop.f32.mrb[34].mxu1  ;;  %v1039_v23 = vpop.f32.mrb[35].mxu0 }
 0x133   : > { %v1517_v24 = vmax.f32 %v1301_v15, 0.0  ;;  %v1451_v25 = vmax.f32 %v1037_v16, 0.0  ;;  %v1304_v26 = vadd.f32 %v2858_v22, %v3320_v6  ;;  %v1040_v27 = vadd.f32 %v3320_v6, %v1039_v23  ;;  %v1295_v28 = vpop.f32.mrb[35].mxu1 }
 0x134   : > { %v2594_v29 = vpack.c.bf16 %v1453_v19, %v1453_v19  ;;  %v1515_v30 = vmax.f32 %v1293_v20, 0.0  ;;  %v1454_v31 = vmax.f32 %v1048_v21, 0.0  ;;  %v1296_v32 = vadd.f32 %v3320_v6, %v1295_v28 }
 0x135   : > { %v2658_v33 = vpack.c.bf16 %v1517_v24, %v1517_v24  ;;  %v2592_v34 = vpack.c.bf16 %v1451_v25, %v1451_v25  ;;  %v1518_v35 = vmax.f32 %v1304_v26, 0.0  ;;  %v1452_v36 = vmax.f32 %v1040_v27, 0.0 }
 0x136   : > { %2094 = vst.msk [vmem:[%s3332_s18 + $0x88] sm:$0xf] %vm2059_vm3, %v2594_v29  ;;  %v2656_v37 = vpack.c.bf16 %v1515_v30, %v1515_v30  ;;  %v2595_v38 = vpack.c.bf16 %v1454_v31, %v1454_v31  ;;  %v1516_v39 = vmax.f32 %v1296_v32, 0.0 }
 0x137   : > { %2158 = vst.msk [vmem:[%s3332_s18 + $0x188] sm:$0xf] %vm2059_vm3, %v2658_v33  ;;  %2092 = vst.msk [vmem:[%s3332_s18 + $0x80] sm:$0xf] %vm2059_vm3, %v2592_v34  ;;  %v2659_v40 = vpack.c.bf16 %v1518_v35, %v1518_v35  ;;  %v2593_v41 = vpack.c.bf16 %v1452_v36, %v1452_v36  ;;  %v2797_v42 = vpop.f32.mrb[36].mxu0 }
 0x138   : > { %2156 = vst.msk [vmem:[%s3332_s18 + $0x180] sm:$0xf] %vm2059_vm3, %v2656_v37  ;;  %2095 = vst.msk [vmem:[%s3332_s18 + $0x8c] sm:$0xf] %vm2059_vm3, %v2595_v38  ;;  %v2657_v43 = vpack.c.bf16 %v1516_v39, %v1516_v39  ;;  %v1061_v44 = vadd.f32 %v2797_v42, %v3320_v6  ;;  %v2861_v45 = vpop.f32.mrb[36].mxu1  ;;  %v1052_v46 = vpop.f32.mrb[37].mxu0 }
 0x139   : > { %2159 = vst.msk [vmem:[%s3332_s18 + $0x18c] sm:$0xf] %vm2059_vm3, %v2659_v40  ;;  %2093 = vst.msk [vmem:[%s3332_s18 + $0x84] sm:$0xf] %vm2059_vm3, %v2593_v41  ;;  %v1317_v47 = vadd.f32 %v2861_v45, %v3320_v6  ;;  %v1053_v48 = vadd.f32 %v3320_v6, %v1052_v46  ;;  %v1308_v49 = vpop.f32.mrb[37].mxu1  ;;  %v2798_v50 = vpop.f32.mrb[38].mxu0 }
 0x13a   : > { %2157 = vst.msk [vmem:[%s3332_s18 + $0x184] sm:$0xf] %vm2059_vm3, %v2657_v43  ;;  %v1457_v51 = vmax.f32 %v1061_v44, 0.0  ;;  %v1309_v52 = vadd.f32 %v3320_v6, %v1308_v49  ;;  %v1064_v53 = vadd.f32 %v2798_v50, %v3320_v6  ;;  %v2862_v54 = vpop.f32.mrb[38].mxu1  ;;  %v1055_v55 = vpop.f32.mrb[39].mxu0 }
 0x13b   : > { %v1521_v56 = vmax.f32 %v1317_v47, 0.0  ;;  %v1455_v57 = vmax.f32 %v1053_v48, 0.0  ;;  %v1320_v58 = vadd.f32 %v2862_v54, %v3320_v6  ;;  %v1056_v59 = vadd.f32 %v3320_v6, %v1055_v55  ;;  %v1311_v60 = vpop.f32.mrb[39].mxu1 }
 0x13c   : > { %v2598_v61 = vpack.c.bf16 %v1457_v51, %v1457_v51  ;;  %v1519_v62 = vmax.f32 %v1309_v52, 0.0  ;;  %v1458_v63 = vmax.f32 %v1064_v53, 0.0  ;;  %v1312_v0 = vadd.f32 %v3320_v6, %v1311_v60 }
 0x13d   : > { %v2662_v1 = vpack.c.bf16 %v1521_v56, %v1521_v56  ;;  %v2596_v2 = vpack.c.bf16 %v1455_v57, %v1455_v57  ;;  %v1522_v3 = vmax.f32 %v1320_v58, 0.0  ;;  %v1456_v4 = vmax.f32 %v1056_v59, 0.0 }
 0x13e   : > { %2098 = vst.msk [vmem:[%s3332_s18 + $0x98] sm:$0xf] %vm2059_vm3, %v2598_v61  ;;  %v2660_v5 = vpack.c.bf16 %v1519_v62, %v1519_v62  ;;  %v2599_v7 = vpack.c.bf16 %v1458_v63, %v1458_v63  ;;  %v1520_v8 = vmax.f32 %v1312_v0, 0.0 }
 0x13f   : > { %2162 = vst.msk [vmem:[%s3332_s18 + $0x198] sm:$0xf] %vm2059_vm3, %v2662_v1  ;;  %2096 = vst.msk [vmem:[%s3332_s18 + $0x90] sm:$0xf] %vm2059_vm3, %v2596_v2  ;;  %v2663_v9 = vpack.c.bf16 %v1522_v3, %v1522_v3  ;;  %v2597_v10 = vpack.c.bf16 %v1456_v4, %v1456_v4  ;;  %v2801_v11 = vpop.f32.mrb[40].mxu0 }
 0x140   : > { %2160 = vst.msk [vmem:[%s3332_s18 + $0x190] sm:$0xf] %vm2059_vm3, %v2660_v5  ;;  %2099 = vst.msk [vmem:[%s3332_s18 + $0x9c] sm:$0xf] %vm2059_vm3, %v2599_v7  ;;  %v2661_v12 = vpack.c.bf16 %v1520_v8, %v1520_v8  ;;  %v1077_v13 = vadd.f32 %v2801_v11, %v3320_v6  ;;  %v2865_v14 = vpop.f32.mrb[40].mxu1  ;;  %v1068_v15 = vpop.f32.mrb[41].mxu0 }
 0x141   : > { %2163 = vst.msk [vmem:[%s3332_s18 + $0x19c] sm:$0xf] %vm2059_vm3, %v2663_v9  ;;  %2097 = vst.msk [vmem:[%s3332_s18 + $0x94] sm:$0xf] %vm2059_vm3, %v2597_v10  ;;  %v1333_v16 = vadd.f32 %v2865_v14, %v3320_v6  ;;  %v1069_v17 = vadd.f32 %v3320_v6, %v1068_v15  ;;  %v1324_v18 = vpop.f32.mrb[41].mxu1  ;;  %v2802_v19 = vpop.f32.mrb[42].mxu0 }
 0x142   : > { %2161 = vst.msk [vmem:[%s3332_s18 + $0x194] sm:$0xf] %vm2059_vm3, %v2661_v12  ;;  %v1461_v20 = vmax.f32 %v1077_v13, 0.0  ;;  %v1325_v21 = vadd.f32 %v3320_v6, %v1324_v18  ;;  %v1080_v22 = vadd.f32 %v2802_v19, %v3320_v6  ;;  %v2866_v23 = vpop.f32.mrb[42].mxu1  ;;  %v1071_v24 = vpop.f32.mrb[43].mxu0 }
 0x143   : > { %v1525_v25 = vmax.f32 %v1333_v16, 0.0  ;;  %v1459_v26 = vmax.f32 %v1069_v17, 0.0  ;;  %v1336_v27 = vadd.f32 %v2866_v23, %v3320_v6  ;;  %v1072_v28 = vadd.f32 %v3320_v6, %v1071_v24  ;;  %v1327_v29 = vpop.f32.mrb[43].mxu1 }
 0x144   : > { %v2602_v30 = vpack.c.bf16 %v1461_v20, %v1461_v20  ;;  %v1523_v31 = vmax.f32 %v1325_v21, 0.0  ;;  %v1462_v32 = vmax.f32 %v1080_v22, 0.0  ;;  %v1328_v33 = vadd.f32 %v3320_v6, %v1327_v29 }
 0x145   : > { %v2666_v34 = vpack.c.bf16 %v1525_v25, %v1525_v25  ;;  %v2600_v35 = vpack.c.bf16 %v1459_v26, %v1459_v26  ;;  %v1526_v36 = vmax.f32 %v1336_v27, 0.0  ;;  %v1460_v37 = vmax.f32 %v1072_v28, 0.0 }
 0x146   : > { %2102 = vst.msk [vmem:[%s3332_s18 + $0xa8] sm:$0xf] %vm2059_vm3, %v2602_v30  ;;  %v2664_v38 = vpack.c.bf16 %v1523_v31, %v1523_v31  ;;  %v2603_v39 = vpack.c.bf16 %v1462_v32, %v1462_v32  ;;  %v1524_v40 = vmax.f32 %v1328_v33, 0.0 }
 0x147   : > { %2166 = vst.msk [vmem:[%s3332_s18 + $0x1a8] sm:$0xf] %vm2059_vm3, %v2666_v34  ;;  %2100 = vst.msk [vmem:[%s3332_s18 + $0xa0] sm:$0xf] %vm2059_vm3, %v2600_v35  ;;  %v2667_v41 = vpack.c.bf16 %v1526_v36, %v1526_v36  ;;  %v2601_v42 = vpack.c.bf16 %v1460_v37, %v1460_v37  ;;  %v2805_v43 = vpop.f32.mrb[44].mxu0 }
 0x148   : > { %2164 = vst.msk [vmem:[%s3332_s18 + $0x1a0] sm:$0xf] %vm2059_vm3, %v2664_v38  ;;  %2103 = vst.msk [vmem:[%s3332_s18 + $0xac] sm:$0xf] %vm2059_vm3, %v2603_v39  ;;  %v2665_v44 = vpack.c.bf16 %v1524_v40, %v1524_v40  ;;  %v1093_v45 = vadd.f32 %v2805_v43, %v3320_v6  ;;  %v2869_v46 = vpop.f32.mrb[44].mxu1  ;;  %v1084_v47 = vpop.f32.mrb[45].mxu0 }
 0x149   : > { %2167 = vst.msk [vmem:[%s3332_s18 + $0x1ac] sm:$0xf] %vm2059_vm3, %v2667_v41  ;;  %2101 = vst.msk [vmem:[%s3332_s18 + $0xa4] sm:$0xf] %vm2059_vm3, %v2601_v42  ;;  %v1349_v48 = vadd.f32 %v2869_v46, %v3320_v6  ;;  %v1085_v49 = vadd.f32 %v3320_v6, %v1084_v47  ;;  %v1340_v50 = vpop.f32.mrb[45].mxu1  ;;  %v2806_v51 = vpop.f32.mrb[46].mxu0 }
 0x14a   : > { %2165 = vst.msk [vmem:[%s3332_s18 + $0x1a4] sm:$0xf] %vm2059_vm3, %v2665_v44  ;;  %v1465_v52 = vmax.f32 %v1093_v45, 0.0  ;;  %v1341_v53 = vadd.f32 %v3320_v6, %v1340_v50  ;;  %v1096_v54 = vadd.f32 %v2806_v51, %v3320_v6  ;;  %v2870_v55 = vpop.f32.mrb[46].mxu1  ;;  %v1087_v56 = vpop.f32.mrb[47].mxu0 }
 0x14b   : > { %v1529_v57 = vmax.f32 %v1349_v48, 0.0  ;;  %v1463_v58 = vmax.f32 %v1085_v49, 0.0  ;;  %v1352_v59 = vadd.f32 %v2870_v55, %v3320_v6  ;;  %v1088_v60 = vadd.f32 %v3320_v6, %v1087_v56  ;;  %v1343_v61 = vpop.f32.mrb[47].mxu1  ;;  %v3635_v45 = vld [vmem:[%s3774_s2] ss:$0 sm:$0xff] }
 0x14c   : > { %v2606_v62 = vpack.c.bf16 %v1465_v52, %v1465_v52  ;;  %v1527_v63 = vmax.f32 %v1341_v53, 0.0  ;;  %v1466_v0 = vmax.f32 %v1096_v54, 0.0  ;;  %v1344_v1 = vadd.f32 %v3320_v6, %v1343_v61 }
 0x14d   : > { %v2670_v2 = vpack.c.bf16 %v1529_v57, %v1529_v57  ;;  %v2604_v3 = vpack.c.bf16 %v1463_v58, %v1463_v58  ;;  %v1530_v4 = vmax.f32 %v1352_v59, 0.0  ;;  %v1464_v5 = vmax.f32 %v1088_v60, 0.0 }
 0x14e   : > { %2106 = vst.msk [vmem:[%s3332_s18 + $0xb8] sm:$0xf] %vm2059_vm3, %v2606_v62  ;;  %v2668_v7 = vpack.c.bf16 %v1527_v63, %v1527_v63  ;;  %v2607_v8 = vpack.c.bf16 %v1466_v0, %v1466_v0  ;;  %v1528_v9 = vmax.f32 %v1344_v1, 0.0 }
 0x14f   : > { %2170 = vst.msk [vmem:[%s3332_s18 + $0x1b8] sm:$0xf] %vm2059_vm3, %v2670_v2  ;;  %2104 = vst.msk [vmem:[%s3332_s18 + $0xb0] sm:$0xf] %vm2059_vm3, %v2604_v3  ;;  %v2671_v10 = vpack.c.bf16 %v1530_v4, %v1530_v4  ;;  %v2605_v11 = vpack.c.bf16 %v1464_v5, %v1464_v5  ;;  %v2809_v12 = vpop.f32.mrb[48].mxu0 }
 0x150   : > { %2168 = vst.msk [vmem:[%s3332_s18 + $0x1b0] sm:$0xf] %vm2059_vm3, %v2668_v7  ;;  %2107 = vst.msk [vmem:[%s3332_s18 + $0xbc] sm:$0xf] %vm2059_vm3, %v2607_v8  ;;  %v2669_v13 = vpack.c.bf16 %v1528_v9, %v1528_v9  ;;  %v1109_v14 = vadd.f32 %v2809_v12, %v3320_v6  ;;  %v2873_v15 = vpop.f32.mrb[48].mxu1  ;;  %v1100_v16 = vpop.f32.mrb[49].mxu0 }
 0x151   : > { %2171 = vst.msk [vmem:[%s3332_s18 + $0x1bc] sm:$0xf] %vm2059_vm3, %v2671_v10  ;;  %2105 = vst.msk [vmem:[%s3332_s18 + $0xb4] sm:$0xf] %vm2059_vm3, %v2605_v11  ;;  %v1365_v17 = vadd.f32 %v2873_v15, %v3320_v6  ;;  %v1101_v18 = vadd.f32 %v3320_v6, %v1100_v16  ;;  %v1356_v19 = vpop.f32.mrb[49].mxu1  ;;  %v2810_v20 = vpop.f32.mrb[50].mxu0 }
 0x152   : > { %2169 = vst.msk [vmem:[%s3332_s18 + $0x1b4] sm:$0xf] %vm2059_vm3, %v2669_v13  ;;  %v1469_v21 = vmax.f32 %v1109_v14, 0.0  ;;  %v1357_v22 = vadd.f32 %v3320_v6, %v1356_v19  ;;  %v1112_v23 = vadd.f32 %v2810_v20, %v3320_v6  ;;  %v2874_v24 = vpop.f32.mrb[50].mxu1  ;;  %v1103_v25 = vpop.f32.mrb[51].mxu0 }
 0x153   : > { %v1533_v26 = vmax.f32 %v1365_v17, 0.0  ;;  %v1467_v27 = vmax.f32 %v1101_v18, 0.0  ;;  %v1368_v28 = vadd.f32 %v2874_v24, %v3320_v6  ;;  %v1104_v29 = vadd.f32 %v3320_v6, %v1103_v25  ;;  %v1359_v30 = vpop.f32.mrb[51].mxu1 }
 0x154   : > { %v2610_v31 = vpack.c.bf16 %v1469_v21, %v1469_v21  ;;  %v1531_v32 = vmax.f32 %v1357_v22, 0.0  ;;  %v1470_v33 = vmax.f32 %v1112_v23, 0.0  ;;  %v1360_v34 = vadd.f32 %v3320_v6, %v1359_v30 }
 0x155   : > { %v2674_v35 = vpack.c.bf16 %v1533_v26, %v1533_v26  ;;  %v2608_v36 = vpack.c.bf16 %v1467_v27, %v1467_v27  ;;  %v1534_v37 = vmax.f32 %v1368_v28, 0.0  ;;  %v1468_v38 = vmax.f32 %v1104_v29, 0.0 }
 0x156   : > { %2110 = vst.msk [vmem:[%s3332_s18 + $0xc8] sm:$0xf] %vm2059_vm3, %v2610_v31  ;;  %v2672_v39 = vpack.c.bf16 %v1531_v32, %v1531_v32  ;;  %v2611_v40 = vpack.c.bf16 %v1470_v33, %v1470_v33  ;;  %v1532_v41 = vmax.f32 %v1360_v34, 0.0 }
 0x157   : > { %2174 = vst.msk [vmem:[%s3332_s18 + $0x1c8] sm:$0xf] %vm2059_vm3, %v2674_v35  ;;  %2108 = vst.msk [vmem:[%s3332_s18 + $0xc0] sm:$0xf] %vm2059_vm3, %v2608_v36  ;;  %v2675_v42 = vpack.c.bf16 %v1534_v37, %v1534_v37  ;;  %v2609_v43 = vpack.c.bf16 %v1468_v38, %v1468_v38  ;;  %v2813_v44 = vpop.f32.mrb[52].mxu0 }
 0x158   : > { %2172 = vst.msk [vmem:[%s3332_s18 + $0x1c0] sm:$0xf] %vm2059_vm3, %v2672_v39  ;;  %2111 = vst.msk [vmem:[%s3332_s18 + $0xcc] sm:$0xf] %vm2059_vm3, %v2611_v40  ;;  %v2673_v6 = vpack.c.bf16 %v1532_v41, %v1532_v41  ;;  %v1125_v46 = vadd.f32 %v3635_v45, %v2813_v44  ;;  %v2877_v47 = vpop.f32.mrb[52].mxu1  ;;  %v1116_v48 = vpop.f32.mrb[53].mxu0 }
 0x159   : > { %2175 = vst.msk [vmem:[%s3332_s18 + $0x1cc] sm:$0xf] %vm2059_vm3, %v2675_v42  ;;  %2109 = vst.msk [vmem:[%s3332_s18 + $0xc4] sm:$0xf] %vm2059_vm3, %v2609_v43  ;;  %v1381_v49 = vadd.f32 %v3635_v45, %v2877_v47  ;;  %v1117_v50 = vadd.f32 %v3635_v45, %v1116_v48  ;;  %v1372_v51 = vpop.f32.mrb[53].mxu1  ;;  %v2814_v52 = vpop.f32.mrb[54].mxu0 }
 0x15a   : > { %2173 = vst.msk [vmem:[%s3332_s18 + $0x1c4] sm:$0xf] %vm2059_vm3, %v2673_v6  ;;  %v1473_v53 = vmax.f32 %v1125_v46, 0.0  ;;  %v1373_v54 = vadd.f32 %v3635_v45, %v1372_v51  ;;  %v1128_v55 = vadd.f32 %v3635_v45, %v2814_v52  ;;  %v2878_v56 = vpop.f32.mrb[54].mxu1  ;;  %v1119_v57 = vpop.f32.mrb[55].mxu0 }
 0x15b   : > { %v1537_v58 = vmax.f32 %v1381_v49, 0.0  ;;  %v1471_v59 = vmax.f32 %v1117_v50, 0.0  ;;  %v1384_v60 = vadd.f32 %v3635_v45, %v2878_v56  ;;  %v1120_v61 = vadd.f32 %v3635_v45, %v1119_v57  ;;  %v1375_v62 = vpop.f32.mrb[55].mxu1 }
 0x15c   : > { %v2614_v63 = vpack.c.bf16 %v1473_v53, %v1473_v53  ;;  %v1535_v0 = vmax.f32 %v1373_v54, 0.0  ;;  %v1474_v1 = vmax.f32 %v1128_v55, 0.0  ;;  %v1376_v2 = vadd.f32 %v3635_v45, %v1375_v62 }
 0x15d   : > { %v2678_v3 = vpack.c.bf16 %v1537_v58, %v1537_v58  ;;  %v2612_v4 = vpack.c.bf16 %v1471_v59, %v1471_v59  ;;  %v1538_v5 = vmax.f32 %v1384_v60, 0.0  ;;  %v1472_v7 = vmax.f32 %v1120_v61, 0.0 }
 0x15e   : > { %2114 = vst.msk [vmem:[%s3332_s18 + $0xd8] sm:$0xf] %vm2059_vm3, %v2614_v63  ;;  %v2676_v8 = vpack.c.bf16 %v1535_v0, %v1535_v0  ;;  %v2615_v9 = vpack.c.bf16 %v1474_v1, %v1474_v1  ;;  %v1536_v10 = vmax.f32 %v1376_v2, 0.0 }
 0x15f   : > { %2178 = vst.msk [vmem:[%s3332_s18 + $0x1d8] sm:$0xf] %vm2059_vm3, %v2678_v3  ;;  %2112 = vst.msk [vmem:[%s3332_s18 + $0xd0] sm:$0xf] %vm2059_vm3, %v2612_v4  ;;  %v2679_v11 = vpack.c.bf16 %v1538_v5, %v1538_v5  ;;  %v2613_v12 = vpack.c.bf16 %v1472_v7, %v1472_v7  ;;  %v2817_v13 = vpop.f32.mrb[56].mxu0 }
 0x160   : > { %2176 = vst.msk [vmem:[%s3332_s18 + $0x1d0] sm:$0xf] %vm2059_vm3, %v2676_v8  ;;  %2115 = vst.msk [vmem:[%s3332_s18 + $0xdc] sm:$0xf] %vm2059_vm3, %v2615_v9  ;;  %v2677_v14 = vpack.c.bf16 %v1536_v10, %v1536_v10  ;;  %v1141_v15 = vadd.f32 %v3635_v45, %v2817_v13  ;;  %v2881_v16 = vpop.f32.mrb[56].mxu1  ;;  %v1132_v17 = vpop.f32.mrb[57].mxu0 }
 0x161   : > { %2179 = vst.msk [vmem:[%s3332_s18 + $0x1dc] sm:$0xf] %vm2059_vm3, %v2679_v11  ;;  %2113 = vst.msk [vmem:[%s3332_s18 + $0xd4] sm:$0xf] %vm2059_vm3, %v2613_v12  ;;  %v1397_v18 = vadd.f32 %v3635_v45, %v2881_v16  ;;  %v1133_v19 = vadd.f32 %v3635_v45, %v1132_v17  ;;  %v1388_v20 = vpop.f32.mrb[57].mxu1  ;;  %v2818_v21 = vpop.f32.mrb[58].mxu0 }
 0x162   : > { %2177 = vst.msk [vmem:[%s3332_s18 + $0x1d4] sm:$0xf] %vm2059_vm3, %v2677_v14  ;;  %v1477_v22 = vmax.f32 %v1141_v15, 0.0  ;;  %v1389_v23 = vadd.f32 %v3635_v45, %v1388_v20  ;;  %v1144_v24 = vadd.f32 %v3635_v45, %v2818_v21  ;;  %v2882_v25 = vpop.f32.mrb[58].mxu1  ;;  %v1135_v26 = vpop.f32.mrb[59].mxu0 }
 0x163   : > { %v1541_v27 = vmax.f32 %v1397_v18, 0.0  ;;  %v1475_v28 = vmax.f32 %v1133_v19, 0.0  ;;  %v1400_v29 = vadd.f32 %v3635_v45, %v2882_v25  ;;  %v1136_v30 = vadd.f32 %v3635_v45, %v1135_v26  ;;  %v1391_v31 = vpop.f32.mrb[59].mxu1 }
 0x164   : > { %v2618_v32 = vpack.c.bf16 %v1477_v22, %v1477_v22  ;;  %v1539_v33 = vmax.f32 %v1389_v23, 0.0  ;;  %v1478_v34 = vmax.f32 %v1144_v24, 0.0  ;;  %v1392_v35 = vadd.f32 %v3635_v45, %v1391_v31 }
 0x165   : > { %v2682_v36 = vpack.c.bf16 %v1541_v27, %v1541_v27  ;;  %v2616_v37 = vpack.c.bf16 %v1475_v28, %v1475_v28  ;;  %v1542_v38 = vmax.f32 %v1400_v29, 0.0  ;;  %v1476_v39 = vmax.f32 %v1136_v30, 0.0 }
 0x166   : > { %2118 = vst.msk [vmem:[%s3332_s18 + $0xe8] sm:$0xf] %vm2059_vm3, %v2618_v32  ;;  %v2680_v40 = vpack.c.bf16 %v1539_v33, %v1539_v33  ;;  %v2619_v41 = vpack.c.bf16 %v1478_v34, %v1478_v34  ;;  %v1540_v42 = vmax.f32 %v1392_v35, 0.0 }
 0x167   : > { %2182 = vst.msk [vmem:[%s3332_s18 + $0x1e8] sm:$0xf] %vm2059_vm3, %v2682_v36  ;;  %2116 = vst.msk [vmem:[%s3332_s18 + $0xe0] sm:$0xf] %vm2059_vm3, %v2616_v37  ;;  %v2683_v43 = vpack.c.bf16 %v1542_v38, %v1542_v38  ;;  %v2617_v44 = vpack.c.bf16 %v1476_v39, %v1476_v39  ;;  %v2821_v6 = vpop.f32.mrb[60].mxu0 }
 0x168   : > { %2180 = vst.msk [vmem:[%s3332_s18 + $0x1e0] sm:$0xf] %vm2059_vm3, %v2680_v40  ;;  %2119 = vst.msk [vmem:[%s3332_s18 + $0xec] sm:$0xf] %vm2059_vm3, %v2619_v41  ;;  %v2681_v46 = vpack.c.bf16 %v1540_v42, %v1540_v42  ;;  %v1157_v47 = vadd.f32 %v3635_v45, %v2821_v6  ;;  %v2885_v48 = vpop.f32.mrb[60].mxu1  ;;  %v1148_v49 = vpop.f32.mrb[61].mxu0 }
 0x169   : > { %2183 = vst.msk [vmem:[%s3332_s18 + $0x1ec] sm:$0xf] %vm2059_vm3, %v2683_v43  ;;  %2117 = vst.msk [vmem:[%s3332_s18 + $0xe4] sm:$0xf] %vm2059_vm3, %v2617_v44  ;;  %v1413_v50 = vadd.f32 %v3635_v45, %v2885_v48  ;;  %v1149_v51 = vadd.f32 %v3635_v45, %v1148_v49  ;;  %v1404_v52 = vpop.f32.mrb[61].mxu1  ;;  %v2822_v53 = vpop.f32.mrb[62].mxu0 }
 0x16a   : > { %2181 = vst.msk [vmem:[%s3332_s18 + $0x1e4] sm:$0xf] %vm2059_vm3, %v2681_v46  ;;  %v1481_v54 = vmax.f32 %v1157_v47, 0.0  ;;  %v1405_v55 = vadd.f32 %v3635_v45, %v1404_v52  ;;  %v1160_v56 = vadd.f32 %v3635_v45, %v2822_v53  ;;  %v2886_v57 = vpop.f32.mrb[62].mxu1  ;;  %v1151_v58 = vpop.f32.mrb[63].mxu0 }
 0x16b   : > { %v1545_v59 = vmax.f32 %v1413_v50, 0.0  ;;  %v1479_v60 = vmax.f32 %v1149_v51, 0.0  ;;  %v1416_v61 = vadd.f32 %v3635_v45, %v2886_v57  ;;  %v1152_v62 = vadd.f32 %v3635_v45, %v1151_v58  ;;  %v1407_v63 = vpop.f32.mrb[63].mxu1 }
 0x16c   : > { %v2622_v0 = vpack.c.bf16 %v1481_v54, %v1481_v54  ;;  %v1543_v1 = vmax.f32 %v1405_v55, 0.0  ;;  %v1482_v2 = vmax.f32 %v1160_v56, 0.0  ;;  %v1408_v3 = vadd.f32 %v3635_v45, %v1407_v63 }
 0x16d   : > { %v2686_v4 = vpack.c.bf16 %v1545_v59, %v1545_v59  ;;  %v2620_v5 = vpack.c.bf16 %v1479_v60, %v1479_v60  ;;  %v1546_v7 = vmax.f32 %v1416_v61, 0.0  ;;  %v1480_v8 = vmax.f32 %v1152_v62, 0.0 }
 0x16e   : > { %2122 = vst.msk [vmem:[%s3332_s18 + $0xf8] sm:$0xf] %vm2059_vm3, %v2622_v0  ;;  %v2684_v9 = vpack.c.bf16 %v1543_v1, %v1543_v1  ;;  %v2623_v10 = vpack.c.bf16 %v1482_v2, %v1482_v2  ;;  %v1544_v11 = vmax.f32 %v1408_v3, 0.0 }
 0x16f   : > { %2186 = vst.msk [vmem:[%s3332_s18 + $0x1f8] sm:$0xf] %vm2059_vm3, %v2686_v4  ;;  %2120 = vst.msk [vmem:[%s3332_s18 + $0xf0] sm:$0xf] %vm2059_vm3, %v2620_v5  ;;  %v2687_v45 = vpack.c.bf16 %v1546_v7, %v1546_v7  ;;  %v2621_v12 = vpack.c.bf16 %v1480_v8, %v1480_v8 }
 0x170   : > { %2184 = vst.msk [vmem:[%s3332_s18 + $0x1f0] sm:$0xf] %vm2059_vm3, %v2684_v9  ;;  %2123 = vst.msk [vmem:[%s3332_s18 + $0xfc] sm:$0xf] %vm2059_vm3, %v2623_v10  ;;  %v2685_v13 = vpack.c.bf16 %v1544_v11, %v1544_v11 }
 0x171   : > { %2187 = vst.msk [vmem:[%s3332_s18 + $0x1fc] sm:$0xf] %vm2059_vm3, %v2687_v45  ;;  %2121 = vst.msk [vmem:[%s3332_s18 + $0xf4] sm:$0xf] %vm2059_vm3, %v2621_v12 }
 0x172   : > { %2185 = vst.msk [vmem:[%s3332_s18 + $0x1f4] sm:$0xf] %vm2059_vm3, %v2685_v13 }
 0x173   : > { %3029 = shalt.err (!%p3026_p5)
}
 0x174   : > { %s3030_s7 = scalar_lea.hbm %s3710_s28, 8192  ;;  %s3034_s10 = scalar_lea.hbm %s3775_s3, 16384 }
 0x175   : > { %p3031_p6 = scmp.ne.s32.totalorder %s3710_s28, %s3030_s7  ;;  %p3035_p10 = scmp.lt.u32.totalorder %s3710_s28, %s3775_s3 }
 0x176   : > { %p3036_p11 = scmp.lt.u32.totalorder %s3034_s10, %s3030_s7  ;;  %p3038_p13 = scmp.lt.u32.totalorder %s3030_s7, %s3710_s28 }
 0x177   : > { %p3032_p7 = pnand %p3031_p6, %p3160_p4 }
 0x178   : > { %p3037_p12 = por %p3036_p11, %p3035_p10 }
 0x179   : > { %p3033_p9 = pneg %p3032_p7 }
 0x17a   : > { %p3039_p0 = por %p3038_p13, %p3037_p12 }
 0x17c   : > { %p3040_p1 = pnand %p3039_p0, %p3033_p9 }
 0x17e   : > { %3043 = shalt.err (!%p3040_p1)
}
 0x17f   : > { %s3098_s19 = smov 64   ;;  %s3099_s21 = smov 4  }
 0x180   : > { %2891 = dma.vmem_to_hbm [thread:$0]  (%p3160_p4), %s3712_s26, 8192, %s3710_s28, %s3726_s29, %s3098_s19, %s3098_s19, %s3099_s21  }
 0x181 PF: > { %p2897_p2 = scmp.ge.s32.totalorder %s3094_s17, 2  ;;  %s2220_s23 = sand.u32 1, %s3074_s12  }
 0x182   : > { %s2221_s15 = scalar_lea.sflag [#allocation3], %s2220_s23 }
 0x183   : > { %p2894_p3 = pnand %p2897_p2, %p3167_p8 }
 0x185   : > { %3069 = dma.done.wait (!%p2894_p3), %s2221_s15, 8192  }
 0x186   : > { %3071 = vsyncadd (!%p2894_p3), %s2221_s15, 4294959104  ;;  %s16_s17 = sadd.s32 1, %s3094_s17   ;;  %s3778_s12 = smov %s3078_s13 }
 0x187   : > { %p13_p5 = scmp.ge.s32.totalorder %s16_s17, 4   ;;  %s3779_s13 = smov %s3082_s14 }
 0x188   : > { %s3780_s14 = smov %s3173_s25  ;;  %s3781_s15 = smov %s3090_s16 }
 0x189   : > { %s3782_s16 = smov %s3784_s20  ;;  %15 = sbr.rel (!%p13_p5) target bundleno = 4 (0x4), region = 67 }
 0x190   :  { %2226 = vsyncpa [#allocation3], 1 }
 0x191   :  { %2228 = vsyncpa [#allocation3 + $0x1], 1 }

</bundles_post_ra>
